<compile_context>
chip_gen: v5e
topology: v5e:2x2
jax: 0.10.0
libtpu: 0.0.40
codegen_flags: <defaults>
</compile_context>

<pallas_src>
import jax
import jax.numpy as jnp
from jax import lax
from jax.experimental import pallas as pl
from jax.experimental.pallas import tpu as pltpu

POOL_K = 31
POOL_PAD = 15
POOL_DIV = float(POOL_K * POOL_K)  # count_include_pad=True -> divisor is always 961


def _round_up(x, m):
    return (x + m - 1) // m * m


def _structured_loss_kernel(pred_ref, mask_ref, out_ref):
    B, H, W = pred_ref.shape

    # Cast in VMEM (no-op for f32 inputs; halves HBM traffic for bf16/f16 inputs).
    p = pred_ref[...].astype(jnp.float32)   # (B, H, W) logits
    m = mask_ref[...].astype(jnp.float32)   # (B, H, W) targets in [0, 1]

    # --- banded 0/1 matrices for the 31x31 zero-padded box filter, built in-kernel ---
    rh = lax.broadcasted_iota(jnp.int32, (H, H), 0)
    ch = lax.broadcasted_iota(jnp.int32, (H, H), 1)
    band_h = (jnp.abs(rh - ch) <= POOL_PAD).astype(jnp.float32)     # (H, H)
    rw = lax.broadcasted_iota(jnp.int32, (W, W), 0)
    cw = lax.broadcasted_iota(jnp.int32, (W, W), 1)
    band_w = (jnp.abs(rw - cw) <= POOL_PAD).astype(jnp.float32)     # (W, W)

    # --- 31x31 average pool with zero padding (divisor 961) via banded matmuls (MXU) ---
    # First matmul batched over planes by flattening (B, H) into the MXU M dimension.
    tmp = jnp.dot(m.reshape(B * H, W), band_w,
                  preferred_element_type=jnp.float32).reshape(B, H, W)
    # Second matmul statically unrolled per plane (band_h applied along H).
    pooled = jnp.concatenate(
        [jnp.dot(band_h, tmp[b], preferred_element_type=jnp.float32)[None]
         for b in range(B)],
        axis=0) * (1.0 / POOL_DIV)                                   # (B, H, W)

    weit = 1.0 + 5.0 * jnp.abs(pooled - m)

    # --- elementwise BCE-with-logits + sigmoid sharing a single exp per element ---
    e = jnp.exp(-jnp.abs(p))                                         # EUP, once
    bce = jnp.maximum(p, 0.0) - p * m + jnp.log1p(e)                 # stable softplus(-|p|)
    s = jnp.where(p >= 0.0, 1.0, e) / (1.0 + e)                      # sigmoid(p), no 2nd exp

    # --- per-plane partial reductions over H, fused into one (3, B, W) output block ---
    # (the tiny remaining W-reduction is finished in the wrapper)
    out_ref[0] = jnp.sum(bce, axis=1)                                # (B, W)
    out_ref[1] = jnp.sum(s * m * weit, axis=1)                       # (B, W)
    out_ref[2] = jnp.sum((s + m) * weit, axis=1)                     # (B, W)


def structured_loss(pred, mask):
    """Pallas TPU implementation of StructuredLoss.forward (inputs are NCHW)."""
    N, C, H, W = pred.shape
    NC = N * C
    p = pred.reshape(NC, H, W)
    m = mask.reshape(NC, H, W)

    # --- choose B (planes per grid step) from a conservative VMEM budget ---
    # per batched plane: 2 inputs x 2 pipeline buffers + ~6 live f32 intermediates
    plane_bytes = H * W * 4
    per_plane_cost = 10 * plane_bytes
    vmem_budget = 20 * 1024 * 1024            # fits the 32 MiB scoped limit set below
    b_cap = max(8, (vmem_budget // per_plane_cost) // 8 * 8)
    B = int(min(b_cap, _round_up(NC, 8), 64))  # multiple of 8 (output sublane rule), capped
    NC_pad = _round_up(NC, B)

    if NC_pad != NC:
        # Padded planes (pred=0, mask=0) are finite and their outputs are dropped below.
        p = jnp.pad(p, ((0, NC_pad - NC), (0, 0), (0, 0)))
        m = jnp.pad(m, ((0, NC_pad - NC), (0, 0), (0, 0)))

    out = pl.pallas_call(
        _structured_loss_kernel,
        out_shape=jax.ShapeDtypeStruct((3, NC_pad, W), jnp.float32),
        grid=(NC_pad // B,),
        in_specs=[
            pl.BlockSpec((B, H, W), lambda g: (g, 0, 0)),   # pred planes
            pl.BlockSpec((B, H, W), lambda g: (g, 0, 0)),   # mask planes
        ],
        out_specs=pl.BlockSpec((3, B, W), lambda g: (0, g, 0)),
        compiler_params=pltpu.CompilerParams(
            dimension_semantics=("parallel",),              # no cross-step state -> megacore OK
            vmem_limit_bytes=32 * 1024 * 1024),
    )(p, m)

    # Finish the W reduction (tiny) and drop padded planes.
    sums = jnp.sum(out[:, :NC, :], axis=2)                  # (3, NC)
    bce_sum, inter, union = sums[0], sums[1], sums[2]

    # reduce='none' -> legacy reduction='mean' in torch: wbce is the global BCE mean,
    # and (weit * wbce).sum((2,3)) / weit.sum((2,3)) == wbce broadcast over (N, C).
    bce_mean = jnp.sum(bce_sum) / float(NC * H * W)
    wbce = bce_mean

    wiou = 1.0 - (inter + 1.0) / (union - inter + 1.0)
    wdiss = 1.0 - (2.0 * inter + 0.5) / (union + 0.5)
    return jnp.mean(wbce + wiou + wdiss)


def structured_loss_ref(pred, mask):
    """Pure-JAX reference reproducing the PyTorch forward exactly (NCHW)."""
    pred = pred.astype(jnp.float32)
    mask = mask.astype(jnp.float32)
    pooled = lax.reduce_window(
        mask, 0.0, lax.add,
        window_dimensions=(1, 1, POOL_K, POOL_K),
        window_strides=(1, 1, 1, 1),
        padding=((0, 0), (0, 0), (POOL_PAD, POOL_PAD), (POOL_PAD, POOL_PAD)),
    ) / POOL_DIV
    weit = 1.0 + 5.0 * jnp.abs(pooled - mask)
    bce = jnp.maximum(pred, 0.0) - pred * mask + jnp.log1p(jnp.exp(-jnp.abs(pred)))
    bce_mean = jnp.mean(bce)  # legacy 'mean' reduction (reduce='none' is truthy)
    wbce = (weit * bce_mean).sum(axis=(2, 3)) / weit.sum(axis=(2, 3))
    s = jax.nn.sigmoid(pred)
    inter = (s * mask * weit).sum(axis=(2, 3))
    union = ((s + mask) * weit).sum(axis=(2, 3))
    wiou = 1.0 - (inter + 1.0) / (union - inter + 1.0)
    wdiss = 1.0 - (2.0 * inter + 0.5) / (union + 0.5)
    return jnp.mean(wbce + wiou + wdiss)


if __name__ == "__main__":
    key = jax.random.PRNGKey(0)
    k1, k2 = jax.random.split(key)
    N, C, H, W = 2, 4, 16, 16
    pred = jax.random.normal(k1, (N, C, H, W), dtype=jnp.float32)    # logits
    mask = jax.random.uniform(k2, (N, C, H, W), dtype=jnp.float32)   # soft targets in [0,1]

    loss = jax.block_until_ready(structured_loss(pred, mask))
    ref = jax.block_until_ready(structured_loss_ref(pred, mask))

    assert jnp.isfinite(loss), f"non-finite loss: {loss}"
    assert abs(float(loss) - float(ref)) < 2e-3, f"mismatch: kernel={loss} ref={ref}"
    print("KERNEL_OK")
</pallas_src>

<mosaic_0001>
module attributes {stable_mosaic.version = 11 : i64} {
  func.func @_structured_loss_kernel(%arg0: i32, %arg1: memref<8x16x16xf32, #tpu.memory_space<vmem>>, %arg2: memref<8x16x16xf32, #tpu.memory_space<vmem>>, %arg3: memref<3x8x16xf32, #tpu.memory_space<vmem>>) attributes {dimension_semantics = [#tpu.dimension_semantics<parallel>], iteration_bounds = array<i64: 1>, scalar_prefetch = 0 : i64, scratch_operands = 0 : i64, tpu.core_type = #tpu.core_type<tc>, window_params = [{transform_indices = @transform_0, window_bounds = array<i64: 8, 16, 16>}, {transform_indices = @transform_1, window_bounds = array<i64: 8, 16, 16>}, {transform_indices = @transform_2, window_bounds = array<i64: 3, 8, 16>}]} {
    %c0 = arith.constant 0 : index
    %c0_0 = arith.constant 0 : index
    %c0_1 = arith.constant 0 : index
    %0 = vector.load %arg1[%c0, %c0_0, %c0_1] : memref<8x16x16xf32, #tpu.memory_space<vmem>>, vector<8x16x16xf32>
    %c0_2 = arith.constant 0 : index
    %c0_3 = arith.constant 0 : index
    %c0_4 = arith.constant 0 : index
    %1 = vector.load %arg2[%c0_2, %c0_3, %c0_4] : memref<8x16x16xf32, #tpu.memory_space<vmem>>, vector<8x16x16xf32>
    %2 = tpu.iota {dimensions = array<i32: 0>} : vector<16x16xi32>
    %3 = tpu.iota {dimensions = array<i32: 1>} : vector<16x16xi32>
    %4 = arith.subi %2, %3 : vector<16x16xi32>
    %5 = math.absi %4 : vector<16x16xi32>
    %c15_i32 = arith.constant 15 : i32
    %6 = vector.broadcast %c15_i32 : i32 to vector<16x16xi32>
    %7 = arith.cmpi sle, %5, %6 : vector<16x16xi32>
    %8 = arith.extui %7 : vector<16x16xi1> to vector<16x16xi32>
    %9 = arith.sitofp %8 : vector<16x16xi32> to vector<16x16xf32>
    %10 = tpu.iota {dimensions = array<i32: 0>} : vector<16x16xi32>
    %11 = tpu.iota {dimensions = array<i32: 1>} : vector<16x16xi32>
    %12 = arith.subi %10, %11 : vector<16x16xi32>
    %13 = math.absi %12 : vector<16x16xi32>
    %c15_i32_5 = arith.constant 15 : i32
    %14 = vector.broadcast %c15_i32_5 : i32 to vector<16x16xi32>
    %15 = arith.cmpi sle, %13, %14 : vector<16x16xi32>
    %16 = arith.extui %15 : vector<16x16xi1> to vector<16x16xi32>
    %17 = arith.sitofp %16 : vector<16x16xi32> to vector<16x16xf32>
    %18 = vector.shape_cast %1 : vector<8x16x16xf32> to vector<128x16xf32>
    %cst = arith.constant dense<0.000000e+00> : vector<128x16xf32>
    %19 = tpu.matmul %18, %17, %cst {dimension_numbers = #tpu.dot_dimension_numbers<[1], [0], [0], [1], [0, 0, 1, 1], [], []>} : vector<128x16xf32>, vector<16x16xf32>, vector<128x16xf32> -> vector<128x16xf32>
    %20 = vector.shape_cast %19 : vector<128x16xf32> to vector<8x16x16xf32>
    %21 = vector.extract_strided_slice %20 {offsets = [0, 0, 0], sizes = [1, 16, 16], strides = [1, 1, 1]} : vector<8x16x16xf32> to vector<1x16x16xf32>
    %22 = vector.shape_cast %21 : vector<1x16x16xf32> to vector<16x16xf32>
    %cst_6 = arith.constant dense<0.000000e+00> : vector<16x16xf32>
    %23 = tpu.matmul %9, %22, %cst_6 {dimension_numbers = #tpu.dot_dimension_numbers<[1], [0], [0], [1], [0, 0, 1, 1], [], []>} : vector<16x16xf32>, vector<16x16xf32>, vector<16x16xf32> -> vector<16x16xf32>
    %24 = vector.shape_cast %23 : vector<16x16xf32> to vector<1x16x16xf32>
    %25 = vector.extract_strided_slice %20 {offsets = [1, 0, 0], sizes = [1, 16, 16], strides = [1, 1, 1]} : vector<8x16x16xf32> to vector<1x16x16xf32>
    %26 = vector.shape_cast %25 : vector<1x16x16xf32> to vector<16x16xf32>
    %cst_7 = arith.constant dense<0.000000e+00> : vector<16x16xf32>
    %27 = tpu.matmul %9, %26, %cst_7 {dimension_numbers = #tpu.dot_dimension_numbers<[1], [0], [0], [1], [0, 0, 1, 1], [], []>} : vector<16x16xf32>, vector<16x16xf32>, vector<16x16xf32> -> vector<16x16xf32>
    %28 = vector.shape_cast %27 : vector<16x16xf32> to vector<1x16x16xf32>
    %29 = vector.extract_strided_slice %20 {offsets = [2, 0, 0], sizes = [1, 16, 16], strides = [1, 1, 1]} : vector<8x16x16xf32> to vector<1x16x16xf32>
    %30 = vector.shape_cast %29 : vector<1x16x16xf32> to vector<16x16xf32>
    %cst_8 = arith.constant dense<0.000000e+00> : vector<16x16xf32>
    %31 = tpu.matmul %9, %30, %cst_8 {dimension_numbers = #tpu.dot_dimension_numbers<[1], [0], [0], [1], [0, 0, 1, 1], [], []>} : vector<16x16xf32>, vector<16x16xf32>, vector<16x16xf32> -> vector<16x16xf32>
    %32 = vector.shape_cast %31 : vector<16x16xf32> to vector<1x16x16xf32>
    %33 = vector.extract_strided_slice %20 {offsets = [3, 0, 0], sizes = [1, 16, 16], strides = [1, 1, 1]} : vector<8x16x16xf32> to vector<1x16x16xf32>
    %34 = vector.shape_cast %33 : vector<1x16x16xf32> to vector<16x16xf32>
    %cst_9 = arith.constant dense<0.000000e+00> : vector<16x16xf32>
    %35 = tpu.matmul %9, %34, %cst_9 {dimension_numbers = #tpu.dot_dimension_numbers<[1], [0], [0], [1], [0, 0, 1, 1], [], []>} : vector<16x16xf32>, vector<16x16xf32>, vector<16x16xf32> -> vector<16x16xf32>
    %36 = vector.shape_cast %35 : vector<16x16xf32> to vector<1x16x16xf32>
    %37 = vector.extract_strided_slice %20 {offsets = [4, 0, 0], sizes = [1, 16, 16], strides = [1, 1, 1]} : vector<8x16x16xf32> to vector<1x16x16xf32>
    %38 = vector.shape_cast %37 : vector<1x16x16xf32> to vector<16x16xf32>
    %cst_10 = arith.constant dense<0.000000e+00> : vector<16x16xf32>
    %39 = tpu.matmul %9, %38, %cst_10 {dimension_numbers = #tpu.dot_dimension_numbers<[1], [0], [0], [1], [0, 0, 1, 1], [], []>} : vector<16x16xf32>, vector<16x16xf32>, vector<16x16xf32> -> vector<16x16xf32>
    %40 = vector.shape_cast %39 : vector<16x16xf32> to vector<1x16x16xf32>
    %41 = vector.extract_strided_slice %20 {offsets = [5, 0, 0], sizes = [1, 16, 16], strides = [1, 1, 1]} : vector<8x16x16xf32> to vector<1x16x16xf32>
    %42 = vector.shape_cast %41 : vector<1x16x16xf32> to vector<16x16xf32>
    %cst_11 = arith.constant dense<0.000000e+00> : vector<16x16xf32>
    %43 = tpu.matmul %9, %42, %cst_11 {dimension_numbers = #tpu.dot_dimension_numbers<[1], [0], [0], [1], [0, 0, 1, 1], [], []>} : vector<16x16xf32>, vector<16x16xf32>, vector<16x16xf32> -> vector<16x16xf32>
    %44 = vector.shape_cast %43 : vector<16x16xf32> to vector<1x16x16xf32>
    %45 = vector.extract_strided_slice %20 {offsets = [6, 0, 0], sizes = [1, 16, 16], strides = [1, 1, 1]} : vector<8x16x16xf32> to vector<1x16x16xf32>
    %46 = vector.shape_cast %45 : vector<1x16x16xf32> to vector<16x16xf32>
    %cst_12 = arith.constant dense<0.000000e+00> : vector<16x16xf32>
    %47 = tpu.matmul %9, %46, %cst_12 {dimension_numbers = #tpu.dot_dimension_numbers<[1], [0], [0], [1], [0, 0, 1, 1], [], []>} : vector<16x16xf32>, vector<16x16xf32>, vector<16x16xf32> -> vector<16x16xf32>
    %48 = vector.shape_cast %47 : vector<16x16xf32> to vector<1x16x16xf32>
    %49 = vector.extract_strided_slice %20 {offsets = [7, 0, 0], sizes = [1, 16, 16], strides = [1, 1, 1]} : vector<8x16x16xf32> to vector<1x16x16xf32>
    %50 = vector.shape_cast %49 : vector<1x16x16xf32> to vector<16x16xf32>
    %cst_13 = arith.constant dense<0.000000e+00> : vector<16x16xf32>
    %51 = tpu.matmul %9, %50, %cst_13 {dimension_numbers = #tpu.dot_dimension_numbers<[1], [0], [0], [1], [0, 0, 1, 1], [], []>} : vector<16x16xf32>, vector<16x16xf32>, vector<16x16xf32> -> vector<16x16xf32>
    %52 = vector.shape_cast %51 : vector<16x16xf32> to vector<1x16x16xf32>
    %53 = tpu.concatenate %24, %28, %32, %36, %40, %44, %48, %52 in 0 : vector<1x16x16xf32>, vector<1x16x16xf32>, vector<1x16x16xf32>, vector<1x16x16xf32>, vector<1x16x16xf32>, vector<1x16x16xf32>, vector<1x16x16xf32>, vector<1x16x16xf32> -> vector<8x16x16xf32>
    %cst_14 = arith.constant 0.00104058278 : f32
    %54 = vector.broadcast %cst_14 : f32 to vector<8x16x16xf32>
    %55 = arith.mulf %53, %54 : vector<8x16x16xf32>
    %56 = arith.subf %55, %1 : vector<8x16x16xf32>
    %57 = math.absf %56 : vector<8x16x16xf32>
    %cst_15 = arith.constant 5.000000e+00 : f32
    %58 = vector.broadcast %cst_15 : f32 to vector<8x16x16xf32>
    %59 = arith.mulf %58, %57 : vector<8x16x16xf32>
    %cst_16 = arith.constant 1.000000e+00 : f32
    %60 = vector.broadcast %cst_16 : f32 to vector<8x16x16xf32>
    %61 = arith.addf %60, %59 : vector<8x16x16xf32>
    %62 = math.absf %0 : vector<8x16x16xf32>
    %cst_17 = arith.constant 0.000000e+00 : f32
    %63 = vector.broadcast %cst_17 : f32 to vector<8x16x16xf32>
    %64 = arith.subf %63, %62 : vector<8x16x16xf32>
    %65 = math.exp %64 : vector<8x16x16xf32>
    %cst_18 = arith.constant 0.000000e+00 : f32
    %66 = vector.broadcast %cst_18 : f32 to vector<8x16x16xf32>
    %67 = arith.maximumf %0, %66 : vector<8x16x16xf32>
    %68 = arith.mulf %0, %1 : vector<8x16x16xf32>
    %69 = arith.subf %67, %68 : vector<8x16x16xf32>
    %70 = math.log1p %65 : vector<8x16x16xf32>
    %71 = arith.addf %69, %70 : vector<8x16x16xf32>
    %cst_19 = arith.constant 0.000000e+00 : f32
    %72 = vector.broadcast %cst_19 : f32 to vector<8x16x16xf32>
    %73 = arith.cmpf oge, %0, %72 : vector<8x16x16xf32>
    %cst_20 = arith.constant 1.000000e+00 : f32
    %74 = vector.broadcast %cst_20 : f32 to vector<8x16x16xf32>
    %75 = arith.select %73, %74, %65 : vector<8x16x16xi1>, vector<8x16x16xf32>
    %cst_21 = arith.constant 1.000000e+00 : f32
    %76 = vector.broadcast %cst_21 : f32 to vector<8x16x16xf32>
    %77 = arith.addf %76, %65 : vector<8x16x16xf32>
    %78 = arith.divf %75, %77 : vector<8x16x16xf32>
    %cst_22 = arith.constant dense<0.000000e+00> : vector<8x16xf32>
    %79 = vector.multi_reduction <add>, %71, %cst_22 [1] : vector<8x16x16xf32> to vector<8x16xf32>
    %c0_23 = arith.constant 0 : index
    %c0_24 = arith.constant 0 : index
    %c0_25 = arith.constant 0 : index
    %80 = vector.load %arg3[%c0_23, %c0_24, %c0_25] : memref<3x8x16xf32, #tpu.memory_space<vmem>>, vector<1x8x16xf32>
    %81 = vector.shape_cast %80 : vector<1x8x16xf32> to vector<8x16xf32>
    %82 = vector.shape_cast %79 : vector<8x16xf32> to vector<1x8x16xf32>
    tpu.vector_store %arg3[%c0_23, %c0_24, %c0_25], %82 {strides = array<i32>} : memref<3x8x16xf32, #tpu.memory_space<vmem>>, vector<1x8x16xf32>,
    %83 = arith.mulf %78, %1 : vector<8x16x16xf32>
    %84 = arith.mulf %83, %61 : vector<8x16x16xf32>
    %cst_26 = arith.constant dense<0.000000e+00> : vector<8x16xf32>
    %85 = vector.multi_reduction <add>, %84, %cst_26 [1] : vector<8x16x16xf32> to vector<8x16xf32>
    %c1 = arith.constant 1 : index
    %c0_27 = arith.constant 0 : index
    %c0_28 = arith.constant 0 : index
    %86 = vector.load %arg3[%c1, %c0_27, %c0_28] : memref<3x8x16xf32, #tpu.memory_space<vmem>>, vector<1x8x16xf32>
    %87 = vector.shape_cast %86 : vector<1x8x16xf32> to vector<8x16xf32>
    %88 = vector.shape_cast %85 : vector<8x16xf32> to vector<1x8x16xf32>
    tpu.vector_store %arg3[%c1, %c0_27, %c0_28], %88 {strides = array<i32>} : memref<3x8x16xf32, #tpu.memory_space<vmem>>, vector<1x8x16xf32>,
    %89 = arith.addf %78, %1 : vector<8x16x16xf32>
    %90 = arith.mulf %89, %61 : vector<8x16x16xf32>
    %cst_29 = arith.constant dense<0.000000e+00> : vector<8x16xf32>
    %91 = vector.multi_reduction <add>, %90, %cst_29 [1] : vector<8x16x16xf32> to vector<8x16xf32>
    %c2 = arith.constant 2 : index
    %c0_30 = arith.constant 0 : index
    %c0_31 = arith.constant 0 : index
    %92 = vector.load %arg3[%c2, %c0_30, %c0_31] : memref<3x8x16xf32, #tpu.memory_space<vmem>>, vector<1x8x16xf32>
    %93 = vector.shape_cast %92 : vector<1x8x16xf32> to vector<8x16xf32>
    %94 = vector.shape_cast %91 : vector<8x16xf32> to vector<1x8x16xf32>
    tpu.vector_store %arg3[%c2, %c0_30, %c0_31], %94 {strides = array<i32>} : memref<3x8x16xf32, #tpu.memory_space<vmem>>, vector<1x8x16xf32>,
    return
  }
  func.func @transform_0(%arg0: i32) -> (i32, i32, i32) {
    %c0_i32 = arith.constant 0 : i32
    %c0_i32_0 = arith.constant 0 : i32
    %c0_i32_1 = arith.constant 0 : i32
    return %arg0, %c0_i32, %c0_i32_0 : i32, i32, i32
  }
  func.func @transform_1(%arg0: i32) -> (i32, i32, i32) {
    %c0_i32 = arith.constant 0 : i32
    %c0_i32_0 = arith.constant 0 : i32
    %c0_i32_1 = arith.constant 0 : i32
    return %arg0, %c0_i32, %c0_i32_0 : i32, i32, i32
  }
  func.func @transform_2(%arg0: i32) -> (i32, i32, i32) {
    %c0_i32 = arith.constant 0 : i32
    %c0_i32_0 = arith.constant 0 : i32
    %c0_i32_1 = arith.constant 0 : i32
    return %c0_i32, %arg0, %c0_i32_0 : i32, i32, i32
  }
}

</mosaic_0001>

<bundles_post_ra>
// kernel: tpu_custom_call.1
= control target key start
LH: loop header
LB: loop body
LE: loop exit
PB: predicated region body
PF: predicated region fallthrough
CT: control target
= control target key end

     0   :  { %7 = vsyncpa [#allocation3], 0  ;;  %s2785_s0 = inlined_call_operand.hbm [shape: f32[8,16,16], index: 0, kind: input, shape index: {}]   ;;  %s2786_s1 = inlined_call_operand.hbm [shape: f32[8,16,16], index: 1, kind: input, shape index: {}]   ;;  %s2787_s2 = inlined_call_operand.hbm [shape: f32[3,8,16], index: 2, kind: output, shape index: {}]  }
   0x1   :  { %8 = vsyncpa [#allocation6], 0 }
   0x2   :  { %9 = vsyncpa [#allocation4], 0  ;;  %s14_s11 = sshll.u32 %s2785_s0, 4  ;;  %s1644_s12 = smov [#allocation2]   ;;  %s15_s11 = int_to_ptr.hbm [resolvable:$true] %s14_s11 }
   0x3   :  { %s16_s13 = sshll.u32 %s1644_s12, 4  ;;  %s27_s16 = sshll.u32 %s2786_s1, 4  ;;  %s17_s13 = int_to_ptr.vmem [resolvable:$true] %s16_s13  ;;  %s28_s16 = int_to_ptr.hbm [resolvable:$true] %s27_s16 }
   0x4   :  { %s1645_s17 = smov 128   ;;  %s1646_s18 = smov 8  }
   0x5   :  { %22 = dma.hbm_to_vmem [thread:$0]  %s15_s11, 2048, %s17_s13, [#allocation3], %s1645_s17, %s1645_s17, %s1646_s18  }
   0x6   :  { %s1647_s19 = smov [#allocation5]  }
   0x7   :  { %s29_s20 = sshll.u32 %s1647_s19, 4  ;;  %s30_s20 = int_to_ptr.vmem [resolvable:$true] %s29_s20 }
   0x8   :  { %35 = dma.hbm_to_vmem [thread:$0]  %s28_s16, 2048, %s30_s20, [#allocation6], %s1645_s17, %s1645_s17, %s1646_s18  }
   0x9   :  { %1638 = dma.done.wait [#allocation3], 2048  }
   0xa   :  { %1639 = vsyncadd [#allocation3], 4294965248 }
   0xb   :  { %1640 = dma.done.wait [#allocation6], 2048  }
   0xc   :  { %1641 = vsyncadd [#allocation6], 4294965248  ;;  %v76_v0 = vlaneseq  ;;  %v1648_v10 = vmov 1.0   ;;  %v1679_v11 = vld [vmem:[#allocation5] sm:$0xff]  ;;  %vm95_vm4 = vcmask 130048   ;;  %v1698_v14 = vld [vmem:[#allocation5 + $0x8] sm:$0xff] }
   0xd   :  { %v1682_v12 = vld [vmem:[#allocation5 + $0x60] sm:$0xff]  ;;  %v1700_v15 = vld [vmem:[#allocation5 + $0x68] sm:$0xff]  ;;  %v1706_v16 = vld [vmem:[#allocation5 + $0x50] sm:$0xff]  ;;  %v1649_v30 = vmov 0.0   ;;  %s1650_s0 = smov [#allocation7]   ;;  %s1385_s23 = sshll.u32 %s2787_s2, 4  ;;  %s1386_s23 = int_to_ptr.hbm [resolvable:$true] %s1385_s23 }
   0xe   :  { %v77_v1 = vshrl.u32 %v76_v0, 7  ;;  %v80_v2 = vand.u32 127, %v76_v0  ;;  %v1688_v13 = vld [vmem:[#allocation5 + $0x40] sm:$0xff]  ;;  %v1708_v17 = vld [vmem:[#allocation5 + $0x48] sm:$0xff]  ;;  %v1714_v18 = vld [vmem:[#allocation5 + $0x10] sm:$0xff]  ;;  %s1383_s1 = sshll.u32 %s1650_s0, 4  ;;  %s1384_s1 = int_to_ptr.vmem [resolvable:$true] %s1383_s1 }
   0xf   :  { %v1716_v19 = vld [vmem:[#allocation5 + $0x70] sm:$0xff]  ;;  %v1720_v20 = vld [vmem:[#allocation5 + $0x58] sm:$0xff]  ;;  %v1734_v23 = vld [vmem:[#allocation5 + $0x20] sm:$0xff] }
  0x10   :  { %v78_v3 = vadd.s32 8, %v77_v1  ;;  %v81_v4 = vsub.s32 %v77_v1, %v80_v2  ;;  %v1726_v21 = vld [vmem:[#allocation5 + $0x18] sm:$0xff]  ;;  %v1738_v24 = vld [vmem:[#allocation5 + $0x28] sm:$0xff]  ;;  %v1742_v25 = vld [vmem:[#allocation5 + $0x30] sm:$0xff] }
  0x11   :  { %v1728_v22 = vld [vmem:[#allocation5 + $0x78] sm:$0xff]  ;;  %v1759_v33 = vld [vmem:[#allocation2] sm:$0xff]  ;;  %v1761_v36 = vld [vmem:[#allocation2 + $0x8] sm:$0xff] }
  0x12   :  { %v82_v5 = vsub.s32 %v78_v3, %v80_v2  ;;  %vm83_vm0 = vcmp.lt.s32.totalorder %v81_v4, 0  ;;  %v84_v6 = vsub.s32 0, %v81_v4  ;;  %v1746_v26 = vld [vmem:[#allocation5 + $0x38] sm:$0xff]  ;;  %v479_v38 = vand.u32 2147483647, %v1759_v33  ;;  %v1772_v47 = vld [vmem:[#allocation2 + $0x10] sm:$0xff] }
  0x13   :  { %v480_v39 = vand.u32 2147483647, %v1761_v36  ;;  %2819 = vst [vmem:[#allocation11_spill] sm:$0xff] %v1772_v47  ;;  %v1774_v48 = vld [vmem:[#allocation2 + $0x18] sm:$0xff]  ;;  %v481_v50 = vand.u32 2147483647, %v1772_v47 }
  0x14   :  { %vm86_vm1 = vcmp.lt.s32.totalorder %v82_v5, 0  ;;  %v87_v7 = vsub.s32 0, %v82_v5  ;;  %v85_v8 = vsel %vm83_vm0, %v84_v6, %v81_v4  ;;  %v495_v41 = vsub.f32 0.0, %v479_v38  ;;  %2820 = vst [vmem:[#allocation12_spill] sm:$0xff] %v1774_v48 }
  0x15   :  { %vm89_vm3 = vcmp.le.s32.totalorder %v85_v8, 15  ;;  %v496_v42 = vsub.f32 0.0, %v480_v39  ;;  %v482_v53 = vand.u32 2147483647, %v1774_v48  ;;  %v497_v54 = vsub.f32 0.0, %v481_v50 }
  0x16   :  { %v88_v9 = vsel %vm86_vm1, %v87_v7, %v82_v5  ;;  %v1753_v31 = vsel %vm89_vm3, 1.0, %v1649_v30  ;;  %v511_v45 = vmul.f32 1.442695, %v495_v41  ;;  %v1812_v41 = vld [vmem:[#allocation2 + $0x20] sm:$0xff] }
  0x17   :  { %vm90_vm2 = vcmp.le.s32.totalorder %v88_v9, 15  ;;  %v513_v46 = vmul.f32 1.442695, %v496_v42  ;;  %v498_v56 = vsub.f32 0.0, %v482_v53  ;;  %v515_v59 = vmul.f32 1.442695, %v497_v54 }
  0x18   :  { %1401 = vmatpush.msk.msra.mxu0 %vm90_vm2, %v1648_v10  ;;  %1437 = vmatpush.msk.msra.mxu3 %vm90_vm2, %v1648_v10  ;;  %v1764_v37 = vsel %vm90_vm2, 1.0, %v1649_v30  ;;  %1448 = vpow2.f32 %v511_v45  ;;  %v544_v30 = vmax.f32 %v1761_v36, 0.0  ;;  %2824 = vst [vmem:[#allocation16_spill] sm:$0xff] %v1812_v41 }
  0x19   :  { %1435 = vmatpush.msk.msra.mxu1 %vm90_vm2, %v1648_v10  ;;  %1436 = vmatpush.msk.msra.mxu2 %vm90_vm2, %v1648_v10  ;;  %1450 = vpow2.f32 %v513_v46  ;;  %v517_v62 = vmul.f32 1.442695, %v498_v56  ;;  %v1832_v46 = vld [vmem:[#allocation2 + $0x28] sm:$0xff] }
  0x1a   :  { %1402 = vmatpush.msk.msra.mxu0 %vm89_vm3, %v1648_v10  ;;  %1440 = vmatpush.msk.msra.mxu3 %vm89_vm3, %v1648_v10  ;;  %2829 = vst [vmem:[#allocation17_spill] sm:$0xff] %v1832_v46 }
  0x1b   :  { %1403 = vmatmul.msk.f32.vlgmr.msra.gmra.mxu0 %vm95_vm4, %v1679_v11  ;;  %1415 = vmatmul.msk.f32.vlgmr.msra.gmra.mxu3 %vm95_vm4, %v1682_v12 }
  0x1c   :  { %1438 = vmatpush.msk.msra.mxu1 %vm89_vm3, %v1648_v10  ;;  %1439 = vmatpush.msk.msra.mxu2 %vm89_vm3, %v1648_v10 }
  0x1d   :  { %1411 = vmatmul.msk.f32.vlgmr.msra.gmra.mxu1 %vm95_vm4, %v1688_v13  ;;  %1413 = vmatmul.msk.f32.vlgmr.msra.gmra.mxu2 %vm95_vm4, %v1706_v16 }
  0x1e   :  { %v1780_v55 = vpop.eup %1448 }
  0x1f   :  { %v1782_v57 = vpop.eup %1450  ;;  %v1785_v58 = vadd.f32 1.0, %v1780_v55  ;;  %v594_v0 = vmul.f32 -0.5, %v1780_v55  ;;  %v597_v7 = vand.u32 2147483647, %v1780_v55 }
  0x20   :  { %2821 = vst [vmem:[#allocation13_spill] sm:$0xff] %v1782_v57  ;;  %v1788_v61 = vadd.f32 1.0, %v1782_v57  ;;  %v603_v1 = vmul.f32 -0.5, %v1782_v57  ;;  %v606_v8 = vand.u32 2147483647, %v1782_v57 }
  0x21   :  { %1452 = vlog2.f32 %v1785_v58  ;;  %v595_v3 = vadd.f32 1.0, %v594_v0  ;;  %vm1818_vm5 = vcmp.lt.f32.partialorder %v597_v7, 0.0004427343  ;;  %v1844_v0 = vld [vmem:[#allocation2 + $0x60] sm:$0xff] }
  0x22   :  { %1454 = vlog2.f32 %v1788_v61  ;;  %v604_v4 = vadd.f32 1.0, %v603_v1  ;;  %vm1822_vm6 = vcmp.lt.f32.partialorder %v606_v8, 0.0004427343 }
  0x23   :  { %1404 = vmatmul.msk.f32.gmra.mxu0 %vm95_vm4, %v1698_v14  ;;  %1416 = vmatmul.msk.f32.gmra.mxu3 %vm95_vm4, %v1700_v15  ;;  %1456 = vpow2.f32 %v515_v59  ;;  %v596_v38 = vmul.f32 %v1780_v55, %v595_v3 }
  0x24   :  { %1458 = vpow2.f32 %v517_v62 }
  0x25   :  { %1412 = vmatmul.msk.f32.gmra.mxu1 %vm95_vm4, %v1708_v17  ;;  %1414 = vmatmul.msk.f32.gmra.mxu2 %vm95_vm4, %v1720_v20 }
  0x27   :  { %v1453_v2 = vpop.eup %1452 }
  0x28   :  { %v1455_v6 = vpop.eup %1454 }
  0x29   :  { %v1800_v9 = vpop.eup %1456  ;;  %v602_v39 = vmul.f32 0.6931472, %v1455_v6 }
  0x2a   :  { %2822 = vst [vmem:[#allocation14_spill] sm:$0xff] %v1800_v9  ;;  %v1802_v10 = vpop.eup %1458  ;;  %v612_v54 = vmul.f32 -0.5, %v1800_v9  ;;  %v615_v8 = vand.u32 2147483647, %v1800_v9 }
  0x2b   :  { %1405 = vmatmul.msk.f32.gmra.mxu0 %vm95_vm4, %v1714_v18  ;;  %1417 = vmatmul.msk.f32.gmra.mxu3 %vm95_vm4, %v1716_v19  ;;  %2823 = vst [vmem:[#allocation15_spill] sm:$0xff] %v1802_v10  ;;  %v1830_v45 = vadd.f32 1.0, %v1802_v10  ;;  %v621_v59 = vmul.f32 -0.5, %v1802_v10 }
  0x2c   :  { %v613_v1 = vadd.f32 1.0, %v612_v54  ;;  %vm616_vm7 = vcmp.lt.f32.partialorder %v615_v8, 0.0004427343 }
  0x33   :  { %1406 = vmatmul.msk.f32.gmra.mxu0 %vm95_vm4, %v1726_v21  ;;  %1418 = vmatmul.msk.f32.gmra.mxu3 %vm95_vm4, %v1728_v22 }
  0x3b   :  { %1407 = vmatmul.msk.f32.gmra.mxu0 %vm95_vm4, %v1734_v23 }
  0x43   :  { %1408 = vmatmul.msk.f32.gmra.mxu0 %vm95_vm4, %v1738_v24 }
  0x4b   :  { %1409 = vmatmul.msk.f32.gmra.mxu0 %vm95_vm4, %v1742_v25 }
  0x53   :  { %1410 = vmatmul.msk.f32.gmra.mxu0 %vm95_vm4, %v1746_v26 }
  0x98   :  { %v161_v27 = vpop.f32.mrf.mxu0 }
  0x9a   :  { %v185_v35 = vpop.f32.mrf.mxu1 }
  0x9e   :  { %v1750_v28 = vpop.f32.mrf.mxu3 }
  0xa0   :  { %v164_v29 = vpop.f32.mrf.mxu0  ;;  %v191_v52 = vpop.f32.mrf.mxu2 }
  0xa1   :  { %229 = vmatpush.msrb.mxu1 %v164_v29  ;;  %v559_v29 = vmul.f32 %v1679_v11, %v1759_v33 }
  0xa2   :  { %v188_v44 = vpop.f32.mrf.mxu1 }
  0xa3   :  { %230 = vmatpush.msrb.mxu1 %v161_v27  ;;  %v543_v27 = vmax.f32 %v1759_v33, 0.0 }
  0xa4   :  { %1419 = vmatmul.msk.f32.vlgmr.msrb.gmra.mxu1 %vm95_vm4, %v1753_v31 }
  0xa6   :  { %v1757_v32 = vpop.f32.mrf.mxu3 }
  0xa8   :  { %v167_v34 = vpop.f32.mrf.mxu0  ;;  %v194_v63 = vpop.f32.mrf.mxu2 }
  0xac   :  { %1420 = vmatmul.msk.f32.gmra.mxu1 %vm95_vm4, %v1764_v37 }
  0xae   :  { %v203_v40 = vpop.f32.mrf.mxu3 }
  0xb0   :  { %v170_v43 = vpop.f32.mrf.mxu0 }
  0xb1   :  { %252 = vmatpush.msrb.mxu2 %v170_v43 }
  0xb3   :  { %253 = vmatpush.msrb.mxu2 %v167_v34  ;;  %v560_v34 = vmul.f32 %v1698_v14, %v1761_v36 }
  0xb4   :  { %1421 = vmatmul.msk.f32.vlgmr.msrb.gmra.mxu2 %vm95_vm4, %v1753_v31 }
  0xb5   :  { %321 = vmatpush.msra.mxu2 %v188_v44  ;;  %v1827_v44 = vadd.f32 1.0, %v1800_v9  ;;  %v576_v50 = vsub.f32 %v544_v30, %v560_v34  ;;  %v545_v34 = vmax.f32 %v1772_v47, 0.0 }
  0xb6   :  { %v206_v49 = vpop.f32.mrf.mxu3 }
  0xb7   :  { %322 = vmatpush.msra.mxu2 %v185_v35  ;;  %v593_v35 = vmul.f32 0.6931472, %v1453_v2  ;;  %1460 = vlog2.f32 %v1827_v44 }
  0xb8   :  { %v173_v51 = vpop.f32.mrf.mxu0  ;;  %1462 = vlog2.f32 %v1830_v45 }
  0xb9   :  { %390 = vmatpush.msrb.mxu2 %v206_v49  ;;  %v575_v49 = vsub.f32 %v543_v27, %v559_v29  ;;  %v491_v27 = vand.u32 2147483647, %v1844_v0 }
  0xbb   :  { %391 = vmatpush.msrb.mxu2 %v203_v40  ;;  %v605_v40 = vmul.f32 %v1782_v57, %v604_v4  ;;  %v622_v4 = vadd.f32 1.0, %v621_v59 }
  0xbc   :  { %1422 = vmatmul.msk.f32.gmra.mxu2 %vm95_vm4, %v1764_v37 }
  0xbd   :  { %v608_v53 = vsel %vm1822_vm6, %v605_v40, %v602_v39  ;;  %v1461_v3 = vpop.eup %1460  ;;  %v562_v39 = vmul.f32 %v1726_v21, %v1774_v48 }
  0xbe   :  { %v1463_v7 = vpop.eup %1462  ;;  %v611_v42 = vmul.f32 0.6931472, %v1461_v3 }
  0xbf   :  { %v620_v43 = vmul.f32 0.6931472, %v1463_v7 }
  0xc0   :  { %v176_v60 = vpop.f32.mrf.mxu0 }
  0xc1   :  { %275 = vmatpush.msrb.mxu3 %v176_v60  ;;  %v484_v60 = vand.u32 2147483647, %v1832_v46 }
  0xc3   :  { %276 = vmatpush.msrb.mxu3 %v173_v51  ;;  %v483_v51 = vand.u32 2147483647, %v1812_v41  ;;  %v500_v6 = vsub.f32 0.0, %v484_v60 }
  0xc4   :  { %1423 = vmatmul.msk.f32.vlgmr.msrb.gmra.mxu3 %vm95_vm4, %v1753_v31  ;;  %1427 = vmatmul.msk.f32.vlgmr.msra.gmra.mxu2 %vm95_vm4, %v1753_v31 }
  0xc5   :  { %344 = vmatpush.msra.mxu3 %v194_v63  ;;  %v736_v63 = vadd.f32 %v608_v53, %v576_v50  ;;  %v499_v2 = vsub.f32 0.0, %v483_v51  ;;  %v521_v50 = vmul.f32 1.442695, %v500_v6 }
  0xc7   :  { %345 = vmatpush.msra.mxu3 %v191_v52  ;;  %v599_v52 = vsel %vm1818_vm5, %v596_v38, %v593_v35  ;;  %v1040_v30 = vsel %vm95_vm4, %v736_v63, 0.0  ;;  %v561_v35 = vmul.f32 %v1714_v18, %v1772_v47  ;;  %v546_v38 = vmax.f32 %v1774_v48, 0.0 }
  0xc8   :  { %v179_v5 = vpop.f32.mrf.mxu0  ;;  %v735_v62 = vadd.f32 %v599_v52, %v575_v49  ;;  %v519_v40 = vmul.f32 1.442695, %v499_v2  ;;  %v623_v49 = vmul.f32 %v1802_v10, %v622_v4  ;;  %v507_v52 = vsub.f32 0.0, %v491_v27  ;;  %v1879_v4 = vld [vmem:[#allocation2 + $0x40] sm:$0xff] }
  0xc9   :  { %v577_v18 = vsub.f32 %v545_v34, %v561_v35  ;;  %v578_v53 = vsub.f32 %v546_v38, %v562_v39  ;;  %v487_v27 = vand.u32 2147483647, %v1879_v4  ;;  %v563_v34 = vmul.f32 %v1734_v23, %v1812_v41  ;;  %v1898_v35 = vld [vmem:[#allocation2 + $0x68] sm:$0xff] }
  0xca   :  { %v1039_v29 = vsel %vm95_vm4, %v735_v62, 0.0  ;;  %1464 = vpow2.f32 %v519_v40  ;;  %v1901_v38 = vld [vmem:[#allocation2 + $0x48] sm:$0xff]  ;;  %vm804_vm5 = vweird.f32 %v1785_v58 }
  0xcb   :  { %v1041_v51 = vadd.f32 %v1040_v30, %v1039_v29  ;;  %1466 = vpow2.f32 %v521_v50  ;;  %v547_v30 = vmax.f32 %v1812_v41, 0.0 }
  0xcc   :  { %1424 = vmatmul.msk.f32.gmra.mxu3 %vm95_vm4, %v1764_v37  ;;  %1428 = vmatmul.msk.f32.gmra.mxu2 %vm95_vm4, %v1764_v37 }
  0xcd   :  { %v1042_v54 = vrot.slane %v1041_v51, 4 }
  0xcf   :  { %v1043_v63 = vadd.f32 %v1042_v54, %v1041_v51  ;;  %v503_v51 = vsub.f32 0.0, %v487_v27  ;;  %v488_v54 = vand.u32 2147483647, %v1901_v38 }
  0xd0   :  { %v182_v56 = vpop.f32.mrf.mxu0  ;;  %v1873_v62 = vpop.eup %1464 }
  0xd1   :  { %298 = vmatpush.msra.mxu1 %v182_v56  ;;  %v535_v56 = vmul.f32 1.442695, %v507_v52  ;;  %2830 = vst [vmem:[#allocation18_spill] sm:$0xff] %v1873_v62  ;;  %v1884_v6 = vadd.f32 1.0, %v1873_v62  ;;  %v1044_v7 = vrot.slane %v1043_v63, 2  ;;  %v504_v41 = vsub.f32 0.0, %v488_v54 }
  0xd2   :  { %v633_v40 = vand.u32 2147483647, %v1873_v62  ;;  %v492_v52 = vand.u32 2147483647, %v1898_v35 }
  0xd3   :  { %299 = vmatpush.msra.mxu1 %v179_v5  ;;  %v624_v5 = vand.u32 2147483647, %v1802_v10  ;;  %1468 = vpow2.f32 %v535_v56  ;;  %v1045_v39 = vadd.f32 %v1044_v7, %v1043_v63 }
  0xd4   :  { %1425 = vmatmul.msk.f32.vlgmr.msra.gmra.mxu1 %vm95_vm4, %v1753_v31  ;;  %1429 = vmatmul.msk.f32.vlgmr.msra.gmra.mxu3 %vm95_vm4, %v1753_v31  ;;  %1470 = vlog2.f32 %v1884_v6  ;;  %vm1930_vm9 = vcmp.lt.f32.partialorder %v633_v40, 0.0004427343 }
  0xd5   :  { %367 = vmatpush.msrb.mxu1 %v1757_v32  ;;  %1433 = vmatmul.msk.f32.vlgmr.msrb.gmra.mxu2 %vm95_vm4, %v1753_v31  ;;  %v614_v32 = vmul.f32 %v1800_v9, %v613_v1  ;;  %vm625_vm8 = vcmp.lt.f32.partialorder %v624_v5, 0.0004427343  ;;  %v1875_v1 = vpop.eup %1466 }
  0xd6   :  { %2831 = vst [vmem:[#allocation19_spill] sm:$0xff] %v1875_v1  ;;  %v1887_v8 = vadd.f32 1.0, %v1875_v1  ;;  %v642_v7 = vand.u32 2147483647, %v1875_v1 }
  0xd7   :  { %368 = vmatpush.msrb.mxu1 %v1750_v28  ;;  %v617_v21 = vsel %vm616_vm7, %v614_v32, %v611_v42  ;;  %v626_v28 = vsel %vm625_vm8, %v623_v49, %v620_v43  ;;  %v639_v32 = vmul.f32 -0.5, %v1875_v1  ;;  %v555_v42 = vmax.f32 %v1844_v0, 0.0  ;;  %v1907_v49 = vld [vmem:[#allocation2 + $0x50] sm:$0xff] }
  0xd8   :  { %v737_v59 = vadd.f32 %v617_v21, %v577_v18  ;;  %v738_v60 = vadd.f32 %v626_v28, %v578_v53  ;;  %2832 = vst [vmem:[#allocation20_spill] sm:$0xff] %v1887_v8  ;;  %1472 = vlog2.f32 %v1887_v8  ;;  %v571_v43 = vmul.f32 %v1682_v12, %v1844_v0  ;;  %v1913_v18 = vld [vmem:[#allocation2 + $0x30] sm:$0xff] }
  0xd9   :  { %v1891_v29 = vpop.eup %1468  ;;  %2834 = vst [vmem:[#allocation22_spill] sm:$0xff] %v1907_v49  ;;  %v579_v53 = vsub.f32 %v547_v30, %v563_v34  ;;  %v548_v28 = vmax.f32 %v1832_v46, 0.0  ;;  %v640_v56 = vadd.f32 1.0, %v639_v32  ;;  %v485_v27 = vand.u32 2147483647, %v1913_v18 }
  0xda   :  { %v1048_v2 = vsel %vm95_vm4, %v737_v59, 0.0  ;;  %v1049_v3 = vsel %vm95_vm4, %v738_v60, 0.0  ;;  %2833 = vst [vmem:[#allocation21_spill] sm:$0xff] %v1891_v29  ;;  %v1910_v50 = vadd.f32 1.0, %v1891_v29  ;;  %v1471_v12 = vpop.eup %1470  ;;  %v702_v0 = vmul.f32 -0.5, %v1891_v29  ;;  %v1922_v60 = vld [vmem:[#allocation2 + $0x58] sm:$0xff] }
  0xdb   :  { %v1050_v5 = vadd.f32 %v1049_v3, %v1048_v2  ;;  %v489_v59 = vand.u32 2147483647, %v1907_v49  ;;  %v1046_v2 = vrot.slane %v1045_v39, 1  ;;  %v564_v3 = vmul.f32 %v1738_v24, %v1832_v46 }
  0xdc   :  { %1426 = vmatmul.msk.f32.gmra.mxu1 %vm95_vm4, %v1764_v37  ;;  %1430 = vmatmul.msk.f32.gmra.mxu3 %vm95_vm4, %v1764_v37  ;;  %2835 = vst [vmem:[#allocation23_spill] sm:$0xff] %v1910_v50  ;;  %1474 = vlog2.f32 %v1910_v50  ;;  %v508_v32 = vsub.f32 0.0, %v492_v52  ;;  %v629_v50 = vmul.f32 0.6931472, %v1471_v12  ;;  %v490_v48 = vand.u32 2147483647, %v1922_v60 }
  0xdd   :  { %1434 = vmatmul.msk.f32.gmra.mxu2 %vm95_vm4, %v1764_v37  ;;  %v1051_v23 = vrot.slane %v1050_v5, 4  ;;  %v641_v46 = vmul.f32 %v1875_v1, %v640_v56  ;;  %v505_v9 = vsub.f32 0.0, %v489_v59  ;;  %v703_v57 = vadd.f32 1.0, %v702_v0 }
  0xde   :  { %v1473_v63 = vpop.eup %1472  ;;  %vm1939_vm10 = vcmp.lt.f32.partialorder %v642_v7, 0.0004427343  ;;  %v537_v54 = vmul.f32 1.442695, %v508_v32  ;;  %v580_v56 = vsub.f32 %v548_v28, %v564_v3  ;;  %v529_v59 = vmul.f32 1.442695, %v504_v41 }
  0xdf   :  { %v1052_v30 = vadd.f32 %v1051_v23, %v1050_v5  ;;  %v638_v24 = vmul.f32 0.6931472, %v1473_v63  ;;  %v705_v5 = vand.u32 2147483647, %v1891_v29  ;;  %v501_v23 = vsub.f32 0.0, %v485_v27 }
  0xe0   :  { %v506_v63 = vsub.f32 0.0, %v490_v48  ;;  %v1945_v1 = vadd.f32 %v1046_v2, %v1045_v39  ;;  %v531_v7 = vmul.f32 1.442695, %v505_v9  ;;  %v704_v27 = vmul.f32 %v1891_v29, %v703_v57  ;;  %v1955_v48 = vld [vmem:[#allocation2 + $0x70] sm:$0xff] }
  0xe1   :  { %v1053_v52 = vrot.slane %v1052_v30, 2  ;;  %v644_v0 = vsel %vm1939_vm10, %v641_v46, %v638_v24  ;;  %vm1950_vm11 = vcmp.lt.f32.partialorder %v705_v5, 0.0004427343  ;;  %v551_v41 = vmax.f32 %v1879_v4, 0.0 }
  0xe2   :  { %v740_v39 = vadd.f32 %v644_v0, %v580_v56  ;;  %v567_v9 = vmul.f32 %v1688_v13, %v1879_v4  ;;  %v553_v57 = vmax.f32 %v1907_v49, 0.0  ;;  %v556_v2 = vmax.f32 %v1898_v35, 0.0 }
  0xe3   :  { %v1054_v34 = vadd.f32 %v1053_v52, %v1052_v30  ;;  %v493_v3 = vand.u32 2147483647, %v1955_v48  ;;  %v549_v32 = vmax.f32 %v1913_v18, 0.0 }
  0xe4   :  { %1431 = vmatmul.msk.f32.vlgmr.msrb.gmra.mxu1 %vm95_vm4, %v1753_v31  ;;  %v630_v31 = vmul.f32 -0.5, %v1873_v62  ;;  %v1058_v24 = vsel %vm95_vm4, %v740_v39, 0.0 }
  0xe5   :  { %v1055_v13 = vrot.slane %v1054_v34, 1  ;;  %v509_v52 = vsub.f32 0.0, %v493_v3 }
  0xe6   :  { %v631_v21 = vadd.f32 1.0, %v630_v31  ;;  %v527_v31 = vmul.f32 1.442695, %v503_v51  ;;  %v1475_v51 = vpop.eup %1474 }
  0xe7   :  { %v701_v8 = vmul.f32 0.6931472, %v1475_v51  ;;  %v1988_v51 = vsub.f32 %v551_v41, %v567_v9  ;;  %v539_v9 = vmul.f32 1.442695, %v509_v52 }
  0xe8   :  { %v632_v10 = vmul.f32 %v1873_v62, %v631_v21  ;;  %v587_v21 = vsub.f32 %v555_v42, %v571_v43  ;;  %1476 = vpow2.f32 %v527_v31  ;;  %v523_v43 = vmul.f32 1.442695, %v501_v23 }
  0xe9   :  { %1478 = vpow2.f32 %v537_v54  ;;  %v707_v28 = vsel %vm1950_vm11, %v704_v27, %v701_v8  ;;  %v572_v31 = vmul.f32 %v1700_v15, %v1898_v35  ;;  %v1978_v8 = vld [vmem:[#allocation2 + $0x78] sm:$0xff]  ;;  %v552_v23 = vmax.f32 %v1901_v38, 0.0 }
  0xea   :  { %v635_v12 = vsel %vm1930_vm9, %v632_v10, %v629_v50  ;;  %1480 = vpow2.f32 %v529_v59  ;;  %v569_v50 = vmul.f32 %v1706_v16, %v1907_v49  ;;  %v568_v15 = vmul.f32 %v1708_v17, %v1901_v38 }
  0xeb   :  { %v739_v10 = vadd.f32 %v635_v12, %v579_v53  ;;  %1482 = vpow2.f32 %v531_v7  ;;  %v1995_v12 = vadd.f32 %v1055_v13, %v1054_v34  ;;  %v1997_v56 = vadd.f32 %v707_v28, %v587_v21 }
  0xec   :  { %1432 = vmatmul.msk.f32.gmra.mxu1 %vm95_vm4, %v1764_v37  ;;  %v1928_v37 = vld [vmem:[#allocation2 + $0x38] sm:$0xff]  ;;  %1484 = vpow2.f32 %v523_v43  ;;  %v2003_v0 = vsub.f32 %v556_v2, %v572_v31  ;;  %v2011_v34 = vsub.f32 %v552_v23, %v568_v15  ;;  %v570_v2 = vmul.f32 %v1720_v20, %v1922_v60 }
  0xed   :  { %v486_v47 = vand.u32 2147483647, %v1928_v37  ;;  %v1057_v30 = vsel %vm95_vm4, %v739_v10, 0.0  ;;  %v550_v20 = vmax.f32 %v1928_v37, 0.0  ;;  %vm819_vm9 = vweird.f32 %v1788_v61 }
  0xee   :  { %v1959_v46 = vpop.eup %1476  ;;  %v1059_v59 = vadd.f32 %v1058_v24, %v1057_v30  ;;  %vm751_vm11 = vcmp.ge.f32.partialorder %v1759_v33, 0.0 }
  0xef   :  { %v502_v62 = vsub.f32 0.0, %v486_v47  ;;  %v533_v47 = vmul.f32 1.442695, %v506_v63  ;;  %2842 = vst [vmem:[#allocation24_spill] sm:$0xff] %v1959_v46  ;;  %v1974_v16 = vadd.f32 1.0, %v1959_v46  ;;  %v1980_v5 = vpop.eup %1478  ;;  %v666_v40 = vmul.f32 -0.5, %v1959_v46 }
  0xf0   :  { %2843 = vst [vmem:[#allocation25_spill] sm:$0xff] %v1980_v5  ;;  %v1986_v35 = vpop.eup %1480  ;;  %v494_v63 = vand.u32 2147483647, %v1978_v8  ;;  %v669_v38 = vand.u32 2147483647, %v1959_v46  ;;  %v2006_v7 = vadd.f32 1.0, %v1980_v5 }
  0xf1   :  { %v525_v53 = vmul.f32 1.442695, %v502_v62  ;;  %v565_v62 = vmul.f32 %v1742_v25, %v1913_v18  ;;  %1486 = vpow2.f32 %v533_v47  ;;  %2844 = vst [vmem:[#allocation26_spill] sm:$0xff] %v1986_v35  ;;  %v1991_v25 = vsub.f32 %v553_v57, %v569_v50  ;;  %v1993_v54 = vpop.eup %1482 }
  0xf2   :  { %2845 = vst [vmem:[#allocation27_spill] sm:$0xff] %v1993_v54  ;;  %v2000_v17 = vpop.eup %1484  ;;  %v667_v42 = vadd.f32 1.0, %v666_v40  ;;  %v684_v43 = vmul.f32 -0.5, %v1993_v54  ;;  %v2014_v21 = vadd.f32 1.0, %v1986_v35  ;;  %v2019_v41 = vadd.f32 1.0, %v1993_v54 }
  0xf3   :  { %1488 = vpow2.f32 %v525_v53  ;;  %2846 = vst [vmem:[#allocation28_spill] sm:$0xff] %v2006_v7  ;;  %v2008_v27 = vsub.f32 %v549_v32, %v565_v62  ;;  %v711_v39 = vmul.f32 -0.5, %v1980_v5  ;;  %v1060_v57 = vrot.slane %v1059_v59, 4 }
  0xf4   :  { %1490 = vlog2.f32 %v1974_v16  ;;  %2847 = vst [vmem:[#allocation29_spill] sm:$0xff] %v2014_v21  ;;  %v2026_v50 = vadd.f32 1.0, %v2000_v17  ;;  %v510_v53 = vsub.f32 0.0, %v494_v63  ;;  %vm2029_vm12 = vcmp.lt.f32.partialorder %v669_v38, 0.0004427343 }
  0xf5   :  { %1492 = vlog2.f32 %v2006_v7  ;;  %v687_v3 = vand.u32 2147483647, %v1993_v54  ;;  %v675_v13 = vmul.f32 -0.5, %v1986_v35  ;;  %v668_v30 = vmul.f32 %v1959_v46, %v667_v42 }
  0xf6   :  { %1494 = vlog2.f32 %v2014_v21  ;;  %v685_v31 = vadd.f32 1.0, %v684_v43  ;;  %v712_v24 = vadd.f32 1.0, %v711_v39  ;;  %v714_v62 = vand.u32 2147483647, %v1980_v5 }
  0xf7   :  { %v2016_v10 = vpop.eup %1486  ;;  %1496 = vlog2.f32 %v2019_v41  ;;  %v648_v15 = vmul.f32 -0.5, %v2000_v17  ;;  %v541_v52 = vmul.f32 1.442695, %v510_v53  ;;  %v2047_v38 = vadd.f32 %v1060_v57, %v1059_v59 }
  0xf8   :  { %1498 = vlog2.f32 %v2026_v50  ;;  %v2039_v32 = vadd.f32 1.0, %v2016_v10  ;;  %v676_v42 = vadd.f32 1.0, %v675_v13  ;;  %v693_v43 = vmul.f32 -0.5, %v2016_v10 }
  0xf9   :  { %v2023_v47 = vpop.eup %1488  ;;  %1500 = vpow2.f32 %v539_v9  ;;  %v686_v9 = vmul.f32 %v1993_v54, %v685_v31  ;;  %vm2052_vm13 = vcmp.lt.f32.partialorder %v687_v3, 0.0004427343  ;;  %v713_v59 = vmul.f32 %v1980_v5, %v712_v24 }
  0xfa   :  { %v1491_v28 = vpop.eup %1490  ;;  %2850 = vst [vmem:[#allocation30_spill] sm:$0xff] %v2039_v32  ;;  %v2043_v40 = vadd.f32 1.0, %v2023_v47  ;;  %1502 = vlog2.f32 %v2039_v32  ;;  %v657_v29 = vmul.f32 -0.5, %v2023_v47  ;;  %vm2059_vm14 = vcmp.lt.f32.partialorder %v714_v62, 0.0004427343 }
  0xfb   :  { %v665_v23 = vmul.f32 0.6931472, %v1491_v28  ;;  %v1493_v63 = vpop.eup %1492  ;;  %v678_v28 = vand.u32 2147483647, %v1986_v35  ;;  %v651_v13 = vand.u32 2147483647, %v2000_v17  ;;  %v677_v24 = vmul.f32 %v1986_v35, %v676_v42 }
  0xfc   :  { %2851 = vst [vmem:[#allocation31_spill] sm:$0xff] %v2043_v40  ;;  %1504 = vlog2.f32 %v2043_v40  ;;  %v1495_v39 = vpop.eup %1494  ;;  %v554_v32 = vmax.f32 %v1922_v60, 0.0  ;;  %v710_v21 = vmul.f32 0.6931472, %v1493_v63  ;;  %v649_v54 = vadd.f32 1.0, %v648_v15 }
  0xfd   :  { %v1497_v53 = vpop.eup %1496  ;;  %v671_v3 = vsel %vm2029_vm12, %v668_v30, %v665_v23  ;;  %1506 = vpow2.f32 %v541_v52  ;;  %v674_v46 = vmul.f32 0.6931472, %v1495_v39  ;;  %v694_v62 = vadd.f32 1.0, %v693_v43 }
  0xfe   :  { %v1499_v31 = vpop.eup %1498  ;;  %1508 = vrcp.f32 %v1785_v58  ;;  %vm2071_vm15 = vcmp.lt.f32.partialorder %v678_v28, 0.0004427343  ;;  %v696_v30 = vand.u32 2147483647, %v2016_v10  ;;  %v658_v23 = vadd.f32 1.0, %v657_v29 }
  0xff   :  { %v2067_v49 = vpop.eup %1500  ;;  %v743_v52 = vadd.f32 %v671_v3, %v1988_v51  ;;  %v683_v63 = vmul.f32 0.6931472, %v1497_v53  ;;  %vm2079_vm0 = vcmp.lt.f32.partialorder %v651_v13, 0.0004427343  ;;  %v660_v43 = vand.u32 2147483647, %v2023_v47 }
 0x100   :  { %v1503_v5 = vpop.eup %1502  ;;  %v716_v39 = vsel %vm2059_vm14, %v713_v59, %v710_v21  ;;  %v647_v28 = vmul.f32 0.6931472, %v1499_v31  ;;  %v650_v35 = vmul.f32 %v2000_v17, %v649_v54  ;;  %v680_v29 = vsel %vm2071_vm15, %v677_v24, %v674_v46 }
 0x101   :  { %v692_v60 = vmul.f32 0.6931472, %v1503_v5  ;;  %v695_v51 = vmul.f32 %v2016_v10, %v694_v62  ;;  %v566_v53 = vmul.f32 %v1746_v26, %v1928_v37  ;;  %vm2095_vm1 = vcmp.lt.f32.partialorder %v696_v30, 0.0004427343 }
 0x102   :  { %v1505_v15 = vpop.eup %1504  ;;  %v2100_v21 = vadd.f32 1.0, %v2067_v49  ;;  %v659_v59 = vmul.f32 %v2023_v47, %v658_v23  ;;  %v689_v46 = vsel %vm2052_vm13, %v686_v9, %v683_v63  ;;  %v586_v5 = vsub.f32 %v554_v32, %v570_v2 }
 0x103   :  { %v2093_v13 = vpop.eup %1506  ;;  %v656_v54 = vmul.f32 0.6931472, %v1505_v15  ;;  %vm2107_vm2 = vcmp.lt.f32.partialorder %v660_v43, 0.0004427343  ;;  %1510 = vrcp.f32 %v1788_v61  ;;  %v748_v57 = vadd.f32 %v716_v39, %v2003_v0 }
 0x104   :  { %v2103_v40 = vpop.eup %1508  ;;  %v653_v31 = vsel %vm2079_vm0, %v650_v35, %v647_v28  ;;  %v744_v24 = vadd.f32 %v680_v29, %v2011_v34  ;;  %1512 = vlog2.f32 %v2100_v21  ;;  %v698_v7 = vsel %vm2095_vm1, %v695_v51, %v692_v60 }
 0x105   :  { %v720_v32 = vmul.f32 -0.5, %v2067_v49  ;;  %v582_v9 = vsub.f32 %v550_v20, %v566_v53  ;;  %v2121_v62 = vadd.f32 1.0, %v2093_v13  ;;  %v1062_v2 = vrot.slane %v2047_v38, 2 }
 0x106   :  { %v745_v0 = vadd.f32 %v689_v46, %v1991_v25  ;;  %v662_v35 = vsel %vm2107_vm2, %v659_v59, %v656_v54  ;;  %v800_v34 = vmul.f32 %v2103_v40, %v1785_v58  ;;  %v1075_v30 = vsel %vm95_vm4, %v743_v52, 0.0 }
 0x107   :  { %v557_v23 = vmax.f32 %v1955_v48, 0.0  ;;  %1514 = vlog2.f32 %v2121_v62  ;;  %v729_v15 = vmul.f32 -0.5, %v2093_v13  ;;  %v741_v63 = vadd.f32 %v653_v31, %v2008_v27 }
 0x108   :  { %v1076_v42 = vsel %vm95_vm4, %v744_v24, 0.0  ;;  %v746_v43 = vadd.f32 %v698_v7, %v586_v5  ;;  %v573_v25 = vmul.f32 %v1716_v19, %v1955_v48  ;;  %v1093_v28 = vsel %vm95_vm4, %v1997_v56, 0.0 }
 0x109   :  { %v2137_v39 = vpop.eup %1510  ;;  %v1094_v52 = vsel %vm95_vm4, %v748_v57, 0.0  ;;  %v721_v20 = vadd.f32 1.0, %v720_v32  ;;  %v742_v29 = vadd.f32 %v662_v35, %v582_v9  ;;  %v1063_v51 = vadd.f32 %v1062_v2, %v2047_v38 }
 0x10a   :  { %v1513_v60 = vpop.eup %1512  ;;  %v1084_v27 = vsel %vm95_vm4, %v745_v0, 0.0  ;;  %v723_v53 = vand.u32 2147483647, %v2067_v49  ;;  %v801_v3 = vsub.f32 1.0, %v800_v34  ;;  %v1077_v54 = vadd.f32 %v1076_v42, %v1075_v30 }
 0x10b   :  { %v730_v59 = vadd.f32 1.0, %v729_v15  ;;  %1516 = vrcp.f32 %v1827_v44  ;;  %v815_v19 = vmul.f32 %v2137_v39, %v1788_v61  ;;  %v1095_v48 = vadd.f32 %v1094_v52, %v1093_v28 }
 0x10c   :  { %v1066_v56 = vsel %vm95_vm4, %v741_v63, 0.0  ;;  %v1085_v46 = vsel %vm95_vm4, %v746_v43, 0.0  ;;  %v589_v5 = vsub.f32 %v557_v23, %v573_v25  ;;  %v719_v38 = vmul.f32 0.6931472, %v1513_v60 }
 0x10d   :  { %v1515_v26 = vpop.eup %1514  ;;  %v722_v57 = vmul.f32 %v2067_v49, %v721_v20  ;;  %v1067_v31 = vsel %vm95_vm4, %v742_v29, 0.0  ;;  %v732_v24 = vand.u32 2147483647, %v2093_v13  ;;  %vm2153_vm3 = vcmp.lt.f32.partialorder %v723_v53, 0.0004427343 }
 0x10e   :  { %v558_v32 = vmax.f32 %v1978_v8, 0.0  ;;  %v574_v9 = vmul.f32 %v1728_v22, %v1978_v8  ;;  %v802_v2 = vmul.f32 %v2103_v40, %v801_v3  ;;  %v1078_v0 = vrot.slane %v1077_v54, 4 }
 0x10f   :  { %v1086_v35 = vadd.f32 %v1085_v46, %v1084_v27  ;;  %v731_v34 = vmul.f32 %v2093_v13, %v730_v59  ;;  %v816_v30 = vsub.f32 1.0, %v815_v19  ;;  %v1068_v23 = vadd.f32 %v1067_v31, %v1066_v56 }
 0x110   :  { %v728_v15 = vmul.f32 0.6931472, %v1515_v26  ;;  %vm805_vm6 = vweird.f32 %v2103_v40  ;;  %v725_v42 = vsel %vm2153_vm3, %v722_v57, %v719_v38  ;;  %vm2168_vm7 = vcmp.lt.f32.partialorder %v732_v24, 0.0004427343 }
 0x111   :  { %v2164_v63 = vpop.eup %1516  ;;  %v810_v8 = vand.u32 2147483648, %v1785_v58  ;;  %1518 = vrcp.f32 %v1830_v45  ;;  %v1064_v43 = vrot.slane %v1063_v51, 1  ;;  %v1096_v25 = vrot.slane %v1095_v48, 4  ;;  %vm2178_vm8 = vmor %vm804_vm5, %vm805_vm6 }
 0x112   :  { %v803_v52 = vadd.f32 %v2103_v40, %v802_v2  ;;  %v808_v20 = vand.u32 2147483647, %v1785_v58  ;;  %v1079_v29 = vadd.f32 %v1078_v0, %v1077_v54  ;;  %v1087_v60 = vrot.slane %v1086_v35, 4 }
 0x113   :  { %v590_v27 = vsub.f32 %v558_v32, %v574_v9  ;;  %v817_v3 = vmul.f32 %v2137_v39, %v816_v30  ;;  %v749_v59 = vadd.f32 %v725_v42, %v589_v5  ;;  %v1069_v19 = vrot.slane %v1068_v23, 4 }
 0x114   :  { %v734_v56 = vsel %vm2168_vm7, %v731_v34, %v728_v15  ;;  %v830_v46 = vmul.f32 %v2164_v63, %v1827_v44  ;;  %v811_v54 = vor.u32 1.1754944e-38, %v810_v8  ;;  %vm820_vm10 = vweird.f32 %v2137_v39 }
 0x115   :  { %v807_v58 = vsel %vm2178_vm8, %v2103_v40, %v803_v52  ;;  %vm809_vm12 = vcmp.eq.f32.partialorder %v808_v20, 8.507059e+37  ;;  %v825_v5 = vand.u32 2147483648, %v1788_v61  ;;  %v2196_v57 = vadd.f32 %v1064_v43, %v1063_v51  ;;  %vm2205_vm13 = vmor %vm819_vm9, %vm820_vm10  ;;  %v2872_v52 = vld [vmem:[#allocation20_spill] sm:$0xff] }
 0x116   :  { %1520 = vrcp.f32 %v1884_v6  ;;  %v818_v31 = vadd.f32 %v2137_v39, %v817_v3  ;;  %v823_v24 = vand.u32 2147483647, %v1788_v61  ;;  %v2201_v7 = vadd.f32 %v1096_v25, %v1095_v48 }
 0x117   :  { %v2194_v38 = vpop.eup %1518  ;;  %v1070_v32 = vadd.f32 %v1069_v19, %v1068_v23  ;;  %v750_v9 = vadd.f32 %v734_v56, %v590_v27  ;;  %v831_v2 = vsub.f32 1.0, %v830_v46  ;;  %v1080_v0 = vrot.slane %v1079_v29, 2 }
 0x118   :  { %v767_v34 = vsel %vm751_vm11, 1.0, %v1780_v55  ;;  %v812_v30 = vsel %vm809_vm12, %v811_v54, %v807_v58  ;;  %v2213_v15 = vadd.f32 %v1087_v60, %v1086_v35  ;;  %v1102_v48 = vsel %vm95_vm4, %v749_v59, 0.0 }
 0x119   :  { %v826_v42 = vor.u32 1.1754944e-38, %v825_v5  ;;  %v845_v61 = vmul.f32 %v2194_v38, %v1830_v45  ;;  %vm752_vm14 = vcmp.ge.f32.partialorder %v1761_v36, 0.0  ;;  %vm824_vm15 = vcmp.eq.f32.partialorder %v823_v24, 8.507059e+37 }
 0x11a   :  { %v1071_v33 = vrot.slane %v1070_v32, 2  ;;  %v1103_v55 = vsel %vm95_vm4, %v750_v9, 0.0  ;;  %v813_v35 = vmul.f32 %v812_v30, %v767_v34  ;;  %v832_v8 = vmul.f32 %v2164_v63, %v831_v2  ;;  %v2876_v2 = vld [vmem:[#allocation11_spill] sm:$0xff] }
 0x11b   :  { %vm834_vm0 = vweird.f32 %v1827_v44  ;;  %1522 = vrcp.f32 %v2872_v52  ;;  %vm835_vm1 = vweird.f32 %v2164_v63  ;;  %v838_v27 = vand.u32 2147483647, %v1827_v44 }
 0x11c   :  { %v2224_v43 = vpop.eup %1520  ;;  %v840_v53 = vand.u32 2147483648, %v1827_v44  ;;  %v846_v59 = vsub.f32 1.0, %v845_v61  ;;  %v2235_v19 = vadd.f32 %v1080_v0, %v1079_v29  ;;  %v833_v56 = vadd.f32 %v2164_v63, %v832_v8  ;;  %vm2247_vm2 = vmor %vm834_vm0, %vm835_vm1  ;;  %v1545_v61 = vld [vmem:[#allocation5 + $0x8] sm:$0xff] }
 0x11d   :  { %v860_v36 = vmul.f32 %v2224_v43, %v1884_v6  ;;  %v2241_v54 = vadd.f32 %v1103_v55, %v1102_v48  ;;  %vm753_vm3 = vcmp.ge.f32.partialorder %v2876_v2, 0.0  ;;  %vm2254_vm5 = vcmp.eq.f32.partialorder %v838_v27, 8.507059e+37  ;;  %v2879_v55 = vld [vmem:[#allocation14_spill] sm:$0xff] }
 0x11e   :  { %v847_v44 = vmul.f32 %v2194_v38, %v846_v59  ;;  %vm849_vm6 = vweird.f32 %v1830_v45  ;;  %v837_v34 = vsel %vm2247_vm2, %v2164_v63, %v833_v56  ;;  %vm850_vm7 = vweird.f32 %v2194_v38 }
 0x11f   :  { %v861_v46 = vsub.f32 1.0, %v860_v36  ;;  %v853_v48 = vand.u32 2147483647, %v1830_v45  ;;  %vm864_vm8 = vweird.f32 %v1884_v6  ;;  %vm865_vm9 = vweird.f32 %v2224_v43  ;;  %vm2285_vm11 = vmor %vm849_vm6, %vm850_vm7 }
 0x120   :  { %1524 = vrcp.f32 %v2026_v50  ;;  %v870_v8 = vand.u32 2147483648, %v1884_v6  ;;  %vm2295_vm12 = vmor %vm864_vm8, %vm865_vm9  ;;  %vm879_vm0 = vweird.f32 %v2872_v52  ;;  %v883_v27 = vand.u32 2147483647, %v2872_v52 }
 0x121   :  { %v232_v28 = vpop.f32.mrf.mxu1  ;;  %v862_v30 = vmul.f32 %v2224_v43, %v861_v46  ;;  %1526 = vrcp.f32 %v1974_v16  ;;  %vm1119_vm2 = vcmask 1041409   ;;  %vm757_vm7 = vcmp.ge.f32.partialorder %v1913_v18, 0.0 }
 0x122   :  { %v399_v26 = vmul.f32 0.0010405828, %v232_v28  ;;  %vm2350_vm6 = vcmp.eq.f32.partialorder %v883_v27, 8.507059e+37  ;;  %vm894_vm8 = vweird.f32 %v2026_v50  ;;  %1528 = vrcp.f32 %v2019_v41 }
 0x123   :  { %v863_v36 = vadd.f32 %v2224_v43, %v862_v30  ;;  %v898_v18 = vand.u32 2147483647, %v2026_v50 }
 0x124   :  { %v415_v51 = vsub.f32 %v399_v26, %v1679_v11  ;;  %v822_v11 = vsel %vm2205_vm13, %v2137_v39, %v818_v31  ;;  %v2873_v39 = vld [vmem:[#allocation13_spill] sm:$0xff]  ;;  %v2239_v26 = vadd.f32 %v1071_v33, %v1070_v32  ;;  %v1544_v31 = vld [vmem:[#allocation5] sm:$0xff]  ;;  %v2252_v32 = vpop.eup %1522  ;;  %vm2299_vm13 = vcmp.eq.f32.partialorder %v853_v48, 8.507059e+37 }
 0x125   :  { %v768_v20 = vsel %vm752_vm14, 1.0, %v2873_v39  ;;  %v827_v60 = vsel %vm824_vm15, %v826_v42, %v822_v11  ;;  %v1135_v24 = vmul.f32 %v1544_v31, %v813_v35  ;;  %v1257_v9 = vadd.f32 %v1544_v31, %v813_v35  ;;  %v2887_v31 = vld [vmem:[#allocation16_spill] sm:$0xff] }
 0x126   :  { %v431_v25 = vand.u32 2147483647, %v415_v51  ;;  %v828_v29 = vmul.f32 %v827_v60, %v768_v20  ;;  %v841_v51 = vor.u32 1.1754944e-38, %v840_v53  ;;  %v855_v11 = vand.u32 2147483648, %v1830_v45  ;;  %v2880_v60 = vld [vmem:[#allocation12_spill] sm:$0xff] }
 0x127   :  { %v875_v33 = vmul.f32 %v2252_v32, %v2872_v52  ;;  %v1073_v63 = vrot.slane %v2239_v26, 1  ;;  %v769_v35 = vsel %vm753_vm3, 1.0, %v2879_v55  ;;  %v868_v39 = vand.u32 2147483647, %v1884_v6  ;;  %v2308_v6 = vpop.eup %1524 }
 0x128   :  { %v447_v58 = vmul.f32 5.0, %v431_v25  ;;  %v848_v25 = vadd.f32 %v2194_v38, %v847_v44  ;;  %v1258_v20 = vadd.f32 %v1545_v61, %v828_v29  ;;  %vm754_vm10 = vcmp.ge.f32.partialorder %v2880_v60, 0.0 }
 0x129   :  { %v235_v23 = vpop.f32.mrf.mxu1  ;;  %v842_v59 = vsel %vm2254_vm5, %v841_v51, %v837_v34  ;;  %v856_v5 = vor.u32 1.1754944e-38, %v855_v11  ;;  %vm755_vm14 = vcmp.ge.f32.partialorder %v2887_v31, 0.0  ;;  %vm869_vm15 = vcmp.eq.f32.partialorder %v868_v39, 8.507059e+37  ;;  %v2889_v11 = vld [vmem:[#allocation18_spill] sm:$0xff] }
 0x12a   :  { %v400_v22 = vmul.f32 0.0010405828, %v235_v23  ;;  %v463_v23 = vadd.f32 1.0, %v447_v58  ;;  %v852_v2 = vsel %vm2285_vm11, %v2194_v38, %v848_v25  ;;  %v1105_v44 = vrot.slane %v2241_v54, 4 }
 0x12b   :  { %v843_v30 = vmul.f32 %v842_v59, %v769_v35  ;;  %v890_v55 = vmul.f32 %v2308_v6, %v2026_v50  ;;  %vm880_vm1 = vweird.f32 %v2252_v32  ;;  %v885_v45 = vand.u32 2147483648, %v2872_v52  ;;  %v1548_v52 = vld [vmem:[#allocation5 + $0x20] sm:$0xff] }
 0x12c   :  { %v416_v28 = vsub.f32 %v400_v22, %v1698_v14  ;;  %v1089_v14 = vrot.slane %v2213_v15, 2  ;;  %v1136_v22 = vmul.f32 %v1545_v61, %v828_v29  ;;  %v1151_v53 = vmul.f32 %v1135_v24, %v463_v23  ;;  %vm2338_vm5 = vmor %vm879_vm0, %vm880_vm1 }
 0x12d   :  { %v1273_v58 = vmul.f32 %v1257_v9, %v463_v23  ;;  %v876_v29 = vsub.f32 1.0, %v875_v33  ;;  %v871_v24 = vor.u32 1.1754944e-38, %v870_v8  ;;  %v867_v9 = vsel %vm2295_vm12, %v2224_v43, %v863_v36  ;;  %v2888_v23 = vld [vmem:[#allocation15_spill] sm:$0xff]  ;;  %v2331_v36 = vpop.eup %1526 }
 0x12e   :  { %v432_v3 = vand.u32 2147483647, %v416_v28  ;;  %v1167_v34 = vsel %vm95_vm4, %v1151_v53, 0.0  ;;  %v770_v61 = vsel %vm754_vm10, 1.0, %v2888_v23  ;;  %vm895_vm9 = vweird.f32 %v2308_v6 }
 0x12f   :  { %v1289_v38 = vsel %vm95_vm4, %v1273_v58, 0.0  ;;  %v877_v43 = vmul.f32 %v2252_v32, %v876_v29  ;;  %v872_v33 = vsel %vm869_vm15, %v871_v24, %v867_v9  ;;  %v1547_v24 = vld [vmem:[#allocation5 + $0x18] sm:$0xff]  ;;  %vm2378_vm10 = vmor %vm894_vm8, %vm895_vm9  ;;  %vm924_vm11 = vweird.f32 %v1974_v16 }
 0x130   :  { %v448_v40 = vmul.f32 5.0, %v432_v3  ;;  %vm925_vm12 = vweird.f32 %v2331_v36  ;;  %vm759_vm15 = vcmp.ge.f32.partialorder %v1879_v4, 0.0  ;;  %v958_v4 = vand.u32 2147483647, %v2019_v41 }
 0x131   :  { %v878_v59 = vadd.f32 %v2252_v32, %v877_v43 }
 0x132   :  { %v464_v42 = vadd.f32 1.0, %v448_v40  ;;  %v1546_v40 = vld [vmem:[#allocation5 + $0x10] sm:$0xff] }
 0x133   :  { %v1137_v39 = vmul.f32 %v1546_v40, %v843_v30  ;;  %v1259_v53 = vadd.f32 %v1546_v40, %v843_v30 }
 0x134   :  { %v1152_v46 = vmul.f32 %v1136_v22, %v464_v42  ;;  %v1274_v51 = vmul.f32 %v1258_v20, %v464_v42  ;;  %v857_v22 = vsel %vm2299_vm13, %v856_v5, %v852_v2  ;;  %v771_v42 = vsel %vm755_vm14, 1.0, %v2889_v11  ;;  %vm2402_vm14 = vmor %vm924_vm11, %vm925_vm12 }
 0x135   :  { %v858_v60 = vmul.f32 %v857_v22, %v770_v61  ;;  %v891_v5 = vsub.f32 1.0, %v890_v55  ;;  %v882_v61 = vsel %vm2338_vm5, %v2252_v32, %v878_v59  ;;  %v886_v55 = vor.u32 1.1754944e-38, %v885_v45 }
 0x136   :  { %v1168_v48 = vsel %vm95_vm4, %v1152_v46, 0.0  ;;  %v1290_v25 = vsel %vm95_vm4, %v1274_v51, 0.0  ;;  %v2890_v46 = vld [vmem:[#allocation17_spill] sm:$0xff]  ;;  %vm2384_vm13 = vcmp.eq.f32.partialorder %v898_v18, 8.507059e+37 }
 0x137   :  { %v255_v28 = vpop.f32.mrf.mxu2  ;;  %v1169_v8 = vadd.f32 %v1168_v48, %v1167_v34  ;;  %v1291_v56 = vadd.f32 %v1290_v25, %v1289_v38  ;;  %vm756_vm3 = vcmp.ge.f32.partialorder %v2890_v46, 0.0  ;;  %v1138_v9 = vmul.f32 %v1547_v24, %v858_v60  ;;  %v2895_v38 = vld [vmem:[#allocation19_spill] sm:$0xff] }
 0x138   :  { %v401_v3 = vmul.f32 0.0010405828, %v255_v28  ;;  %v1260_v51 = vadd.f32 %v1547_v24, %v858_v60  ;;  %v772_v23 = vsel %vm756_vm3, 1.0, %v2895_v38  ;;  %v773_v25 = vsel %vm757_vm7, 1.0, %v2000_v17 }
 0x139   :  { %v1170_v31 = vrot.slane %v1169_v8, 4  ;;  %v887_v58 = vsel %vm2350_vm6, %v886_v55, %v882_v61  ;;  %vm954_vm3 = vweird.f32 %v2019_v41  ;;  %vm2441_vm6 = vcmp.eq.f32.partialorder %v958_v4, 8.507059e+37 }
 0x13a   :  { %v417_v0 = vsub.f32 %v401_v3, %v1546_v40  ;;  %v873_v3 = vmul.f32 %v872_v33, %v771_v42  ;;  %v920_v40 = vmul.f32 %v2331_v36, %v1974_v16  ;;  %v888_v61 = vmul.f32 %v887_v58, %v772_v23 }
 0x13b   :  { %v1171_v42 = vadd.f32 %v1170_v31, %v1169_v8  ;;  %vm758_vm7 = vcmp.ge.f32.partialorder %v1928_v37, 0.0 }
 0x13c   :  { %v433_v35 = vand.u32 2147483647, %v417_v0  ;;  %v2348_v0 = vsel %vm1119_vm2, %v1995_v12, %v1945_v1  ;;  %v2354_v30 = vmul.f32 %v1548_v52, %v873_v3  ;;  %v1292_v1 = vrot.slane %v1291_v56, 4 }
 0x13d   :  { %v892_v12 = vmul.f32 %v2308_v6, %v891_v5  ;;  %v921_v22 = vsub.f32 1.0, %v920_v40  ;;  %v1172_v59 = vrot.slane %v1171_v42, 2 }
 0x13e   :  { %v449_v29 = vmul.f32 5.0, %v433_v35  ;;  %v2364_v35 = vadd.f32 %v1548_v52, %v873_v3  ;;  %v1293_v60 = vadd.f32 %v1292_v1, %v1291_v56 }
 0x13f   :  { %v258_v28 = vpop.f32.mrf.mxu2  ;;  %v893_v8 = vadd.f32 %v2308_v6, %v892_v12  ;;  %v922_v27 = vmul.f32 %v2331_v36, %v921_v22 }
 0x140   :  { %v402_v20 = vmul.f32 0.0010405828, %v258_v28  ;;  %v465_v43 = vadd.f32 1.0, %v449_v29  ;;  %v900_v28 = vand.u32 2147483648, %v2026_v50  ;;  %v2389_v50 = vpop.eup %1528  ;;  %v1294_v34 = vrot.slane %v1293_v60, 2 }
 0x141   :  { %v923_v40 = vadd.f32 %v2331_v36, %v922_v27  ;;  %vm955_vm5 = vweird.f32 %v2389_v50 }
 0x142   :  { %v418_v2 = vsub.f32 %v402_v20, %v1547_v24  ;;  %v1153_v3 = vmul.f32 %v1137_v39, %v465_v43  ;;  %v1275_v45 = vmul.f32 %v1259_v53, %v465_v43  ;;  %v901_v56 = vor.u32 1.1754944e-38, %v900_v28  ;;  %v1549_v43 = vld [vmem:[#allocation5 + $0x40] sm:$0xff]  ;;  %vm2455_vm8 = vmor %vm954_vm3, %vm955_vm5 }
 0x143   :  { %v930_v24 = vand.u32 2147483648, %v1974_v16  ;;  %v897_v53 = vsel %vm2378_vm10, %v2308_v6, %v893_v8  ;;  %v927_v18 = vsel %vm2402_vm14, %v2331_v36, %v923_v40  ;;  %v2416_v28 = vadd.f32 %v1172_v59, %v1171_v42  ;;  %v1550_v8 = vld [vmem:[#allocation5 + $0x28] sm:$0xff] }
 0x144   :  { %v434_v48 = vand.u32 2147483647, %v418_v2  ;;  %v1298_v6 = vsel %vm95_vm4, %v1275_v45, 0.0  ;;  %v902_v22 = vsel %vm2384_vm13, %v901_v56, %v897_v53  ;;  %v1140_v58 = vmul.f32 %v1550_v8, %v888_v61  ;;  %v2903_v45 = vld [vmem:[#allocation24_spill] sm:$0xff] }
 0x145   :  { %v903_v17 = vmul.f32 %v902_v22, %v773_v25  ;;  %v1262_v59 = vadd.f32 %v1550_v8, %v888_v61 }
 0x146   :  { %v450_v33 = vmul.f32 5.0, %v434_v48 }
 0x147   :  { %v278_v11 = vpop.f32.mrf.mxu3  ;;  %v324_v29 = vpop.f32.mrf.mxu2 }
 0x148   :  { %v466_v32 = vadd.f32 1.0, %v450_v33  ;;  %v403_v20 = vmul.f32 0.0010405828, %v278_v11  ;;  %v407_v31 = vmul.f32 0.0010405828, %v324_v29  ;;  %v931_v11 = vor.u32 1.1754944e-38, %v930_v24 }
 0x149   :  { %v2904_v24 = vld [vmem:[#allocation22_spill] sm:$0xff] }
 0x14a   :  { %v1154_v46 = vmul.f32 %v1138_v9, %v466_v32  ;;  %v1276_v5 = vmul.f32 %v1260_v51, %v466_v32  ;;  %v419_v2 = vsub.f32 %v403_v20, %v1548_v52  ;;  %v928_v9 = vand.u32 2147483647, %v1974_v16  ;;  %v2905_v52 = vld [vmem:[#allocation27_spill] sm:$0xff] }
 0x14b   :  { %v1176_v51 = vsel %vm95_vm4, %v1153_v3, 0.0  ;;  %v423_v23 = vsub.f32 %v407_v31, %v1549_v43  ;;  %v950_v16 = vmul.f32 %v2389_v50, %v2019_v41  ;;  %v2902_v3 = vld [vmem:[#allocation31_spill] sm:$0xff]  ;;  %vm761_vm1 = vcmp.ge.f32.partialorder %v2904_v24, 0.0 }
 0x14c   :  { %v1177_v48 = vsel %vm95_vm4, %v1154_v46, 0.0  ;;  %v1299_v1 = vsel %vm95_vm4, %v1276_v5, 0.0  ;;  %v435_v33 = vand.u32 2147483647, %v419_v2  ;;  %vm929_vm0 = vcmp.eq.f32.partialorder %v928_v9, 8.507059e+37 }
 0x14d   :  { %v1178_v55 = vadd.f32 %v1177_v48, %v1176_v51  ;;  %v1300_v20 = vadd.f32 %v1299_v1, %v1298_v6  ;;  %1530 = vrcp.f32 %v2902_v3  ;;  %v2419_v46 = vadd.f32 %v1294_v34, %v1293_v60  ;;  %v1551_v48 = vld [vmem:[#allocation5 + $0x30] sm:$0xff] }
 0x14e   :  { %v775_v5 = vsel %vm759_vm15, 1.0, %v2903_v45  ;;  %v439_v39 = vand.u32 2147483647, %v423_v23  ;;  %v932_v56 = vsel %vm929_vm0, %v931_v11, %v927_v18  ;;  %v951_v36 = vsub.f32 1.0, %v950_v16 }
 0x14f   :  { %v281_v38 = vpop.f32.mrf.mxu3  ;;  %v451_v31 = vmul.f32 5.0, %v435_v33  ;;  %v1179_v42 = vrot.slane %v1178_v55, 4  ;;  %v1174_v2 = vrot.slane %v2416_v28, 1  ;;  %v1301_v53 = vrot.slane %v1300_v20, 4 }
 0x150   :  { %v404_v12 = vmul.f32 0.0010405828, %v281_v38  ;;  %v1296_v25 = vrot.slane %v2419_v46, 1  ;;  %v933_v9 = vmul.f32 %v932_v56, %v775_v5  ;;  %v960_v51 = vand.u32 2147483648, %v2019_v41 }
 0x151   :  { %v301_v32 = vpop.f32.mrf.mxu1  ;;  %v2431_v38 = vmul.f32 %v1551_v48, %v903_v17  ;;  %v455_v61 = vmul.f32 5.0, %v439_v39  ;;  %v2434_v6 = vsel %vm761_vm1, 1.0, %v2905_v52  ;;  %v952_v1 = vmul.f32 %v2389_v50, %v951_v36 }
 0x152   :  { %v420_v27 = vsub.f32 %v404_v12, %v1550_v8  ;;  %v405_v40 = vmul.f32 0.0010405828, %v301_v32  ;;  %v467_v12 = vadd.f32 1.0, %v451_v31  ;;  %v1180_v22 = vadd.f32 %v1179_v42, %v1178_v55 }
 0x153   :  { %v2429_v34 = vpop.eup %1530  ;;  %v2437_v23 = vadd.f32 %v1551_v48, %v903_v17  ;;  %v1302_v11 = vadd.f32 %v1301_v53, %v1300_v20  ;;  %v1143_v32 = vmul.f32 %v1549_v43, %v933_v9  ;;  %v961_v8 = vor.u32 1.1754944e-38, %v960_v51 }
 0x154   :  { %v436_v29 = vand.u32 2147483647, %v420_v27  ;;  %v421_v33 = vsub.f32 %v405_v40, %v1551_v48  ;;  %v905_v45 = vmul.f32 %v2429_v34, %v2902_v3  ;;  %v471_v55 = vadd.f32 1.0, %v455_v61  ;;  %v1552_v40 = vld [vmem:[#allocation5 + $0x38] sm:$0xff]  ;;  %v1553_v61 = vld [vmem:[#allocation5 + $0x50] sm:$0xff] }
 0x155   :  { %v1265_v17 = vadd.f32 %v1549_v43, %v933_v9  ;;  %v1155_v20 = vmul.f32 %v2354_v30, %v467_v12  ;;  %v1277_v39 = vmul.f32 %v2364_v35, %v467_v12  ;;  %v1181_v56 = vrot.slane %v1180_v22, 2 }
 0x156   :  { %v452_v60 = vmul.f32 5.0, %v436_v29  ;;  %v953_v29 = vadd.f32 %v2389_v50, %v952_v1  ;;  %v1303_v43 = vrot.slane %v1302_v11, 2  ;;  %v437_v24 = vand.u32 2147483647, %v421_v33 }
 0x157   :  { %v347_v5 = vpop.f32.mrf.mxu3  ;;  %vm909_vm9 = vweird.f32 %v2902_v3  ;;  %vm910_vm10 = vweird.f32 %v2429_v34  ;;  %v913_v30 = vand.u32 2147483647, %v2902_v3  ;;  %v915_v4 = vand.u32 2147483648, %v2902_v3 }
 0x158   :  { %v468_v16 = vadd.f32 1.0, %v452_v60  ;;  %v409_v36 = vmul.f32 0.0010405828, %v347_v5  ;;  %v906_v60 = vsub.f32 1.0, %v905_v45  ;;  %v957_v41 = vsel %vm2455_vm8, %v2389_v50, %v953_v29  ;;  %vm2476_vm11 = vmor %vm909_vm9, %vm910_vm10  ;;  %v327_v29 = vpop.f32.mrf.mxu2 }
 0x159   :  { %v304_v27 = vpop.f32.mrf.mxu1  ;;  %v1182_v51 = vadd.f32 %v1181_v56, %v1180_v22  ;;  %v1159_v48 = vmul.f32 %v1143_v32, %v471_v55  ;;  %v1304_v1 = vadd.f32 %v1303_v43, %v1302_v11  ;;  %v453_v33 = vmul.f32 5.0, %v437_v24 }
 0x15a   :  { %v1156_v42 = vmul.f32 %v1140_v58, %v468_v16  ;;  %v406_v53 = vmul.f32 0.0010405828, %v304_v27  ;;  %v1278_v35 = vmul.f32 %v1262_v59, %v468_v16  ;;  %v1185_v58 = vsel %vm95_vm4, %v1155_v20, 0.0 }
 0x15b   :  { %v425_v52 = vsub.f32 %v409_v36, %v1553_v61  ;;  %v907_v59 = vmul.f32 %v2429_v34, %v906_v60  ;;  %v1307_v16 = vsel %vm95_vm4, %v1277_v39, 0.0  ;;  %v1281_v27 = vmul.f32 %v1265_v17, %v471_v55 }
 0x15c   :  { %v422_v9 = vsub.f32 %v406_v53, %v1552_v40  ;;  %v1186_v12 = vsel %vm95_vm4, %v1156_v42, 0.0  ;;  %v962_v50 = vsel %vm2441_vm6, %v961_v8, %v957_v41  ;;  %v916_v11 = vor.u32 1.1754944e-38, %v915_v4  ;;  %v2912_v8 = vld [vmem:[#allocation29_spill] sm:$0xff] }
 0x15d   :  { %v1308_v32 = vsel %vm95_vm4, %v1278_v35, 0.0  ;;  %v908_v5 = vadd.f32 %v2429_v34, %v907_v59  ;;  %vm914_vm12 = vcmp.eq.f32.partialorder %v913_v30, 8.507059e+37  ;;  %v1187_v55 = vadd.f32 %v1186_v12, %v1185_v58  ;;  %v2512_v58 = vld [vmem:[#allocation5 + $0x48] sm:$0xff] }
 0x15e   :  { %v438_v45 = vand.u32 2147483647, %v422_v9  ;;  %v441_v17 = vand.u32 2147483647, %v425_v52  ;;  %v774_v18 = vsel %vm758_vm7, 1.0, %v2023_v47  ;;  %1532 = vrcp.f32 %v2912_v8 }
 0x15f   :  { %v1183_v3 = vrot.slane %v1182_v51, 1  ;;  %v1305_v20 = vrot.slane %v1304_v1, 1  ;;  %v469_v39 = vadd.f32 1.0, %v453_v33  ;;  %v912_v56 = vsel %vm2476_vm11, %v2429_v34, %v908_v5  ;;  %v1555_v5 = vld [vmem:[#allocation2 + $0x48] sm:$0xff] }
 0x160   :  { %v1309_v36 = vadd.f32 %v1308_v32, %v1307_v16  ;;  %v963_v31 = vmul.f32 %v962_v50, %v2434_v6  ;;  %v917_v43 = vsel %vm914_vm12, %v916_v11, %v912_v56  ;;  %v408_v42 = vmul.f32 0.0010405828, %v327_v29  ;;  %v2913_v16 = vld [vmem:[#allocation30_spill] sm:$0xff] }
 0x161   :  { %v2493_v24 = vadd.f32 %v1174_v2, %v2416_v28  ;;  %v2498_v37 = vadd.f32 %v1296_v25, %v2419_v46  ;;  %v454_v47 = vmul.f32 5.0, %v438_v45  ;;  %v918_v53 = vmul.f32 %v917_v43, %v774_v18 }
 0x162   :  { %v1188_v60 = vrot.slane %v1187_v55, 4  ;;  %v2501_v34 = vsel %vm95_vm4, %v1159_v48, 0.0  ;;  %v2504_v6 = vsel %vm95_vm4, %v1281_v27, 0.0  ;;  %v457_v30 = vmul.f32 5.0, %v441_v17  ;;  %v350_v27 = vpop.f32.mrf.mxu3 }
 0x163   :  { %v2506_v35 = vadd.f32 %v1183_v3, %v1182_v51  ;;  %v2508_v41 = vadd.f32 %v1305_v20, %v1304_v1  ;;  %v1157_v28 = vmul.f32 %v2431_v38, %v469_v39  ;;  %v1279_v2 = vmul.f32 %v2437_v23, %v469_v39 }
 0x164   :  { %v1533_v46 = vpop.eup %1532  ;;  %v1310_v25 = vrot.slane %v1309_v36, 4  ;;  %v1145_v9 = vmul.f32 %v1553_v61, %v963_v31  ;;  %v1267_v4 = vadd.f32 %v1553_v61, %v963_v31  ;;  %v424_v48 = vsub.f32 %v408_v42, %v2512_v58 }
 0x165   :  { %v470_v52 = vadd.f32 1.0, %v454_v47  ;;  %v1142_v12 = vmul.f32 %v1552_v40, %v918_v53  ;;  %v1264_v33 = vadd.f32 %v1552_v40, %v918_v53  ;;  %v935_v51 = vmul.f32 %v1533_v46, %v2912_v8  ;;  %v2917_v47 = vld [vmem:[#allocation26_spill] sm:$0xff] }
 0x166   :  { %v2516_v59 = vadd.f32 %v1188_v60, %v1187_v55  ;;  %v473_v1 = vadd.f32 1.0, %v457_v30  ;;  %v945_v38 = vand.u32 2147483648, %v2912_v8  ;;  %1534 = vrcp.f32 %v2913_v16  ;;  %v1556_v60 = vld [vmem:[#allocation2 + $0x58] sm:$0xff] }
 0x167   :  { %v936_v23 = vsub.f32 1.0, %v935_v51  ;;  %vm939_vm13 = vweird.f32 %v2912_v8  ;;  %vm940_vm14 = vweird.f32 %v1533_v46  ;;  %v943_v61 = vand.u32 2147483647, %v2912_v8 }
 0x168   :  { %v2522_v50 = vadd.f32 %v1310_v25, %v1309_v36  ;;  %v1194_v40 = vsel %vm95_vm4, %v1157_v28, 0.0  ;;  %v1316_v22 = vsel %vm95_vm4, %v1279_v2, 0.0  ;;  %v440_v11 = vand.u32 2147483647, %v424_v48  ;;  %vm2528_vm0 = vmor %vm939_vm13, %vm940_vm14  ;;  %v2916_v36 = vld [vmem:[#allocation23_spill] sm:$0xff] }
 0x169   :  { %v1158_v32 = vmul.f32 %v1142_v12, %v470_v52  ;;  %v1280_v45 = vmul.f32 %v1264_v33, %v470_v52  ;;  %vm760_vm15 = vcmp.ge.f32.partialorder %v1555_v5, 0.0  ;;  %v937_v29 = vmul.f32 %v1533_v46, %v936_v23  ;;  %v370_v52 = vpop.f32.mrf.mxu1  ;;  %v393_v5 = vpop.f32.mrf.mxu2 }
 0x16a   :  { %v1161_v55 = vmul.f32 %v1145_v9, %v473_v1  ;;  %v1283_v17 = vmul.f32 %v1267_v4, %v473_v1  ;;  %v946_v3 = vor.u32 1.1754944e-38, %v945_v38  ;;  %v410_v20 = vmul.f32 0.0010405828, %v350_v27  ;;  %v2541_v9 = vld [vmem:[#allocation5 + $0x58] sm:$0xff] }
 0x16b   :  { %v1190_v39 = vrot.slane %v2516_v59, 2  ;;  %v938_v56 = vadd.f32 %v1533_v46, %v937_v29  ;;  %vm944_vm1 = vcmp.eq.f32.partialorder %v943_v61, 8.507059e+37  ;;  %1536 = vrcp.f32 %v2916_v36 }
 0x16c   :  { %v1535_v31 = vpop.eup %1534  ;;  %v1312_v43 = vrot.slane %v2522_v50, 2  ;;  %v456_v42 = vmul.f32 5.0, %v440_v11  ;;  %v776_v53 = vsel %vm760_vm15, 1.0, %v2917_v47  ;;  %vm762_vm3 = vcmp.ge.f32.partialorder %v1556_v60, 0.0  ;;  %v2573_v60 = vld [vmem:[#allocation5 + $0x60] sm:$0xff] }
 0x16d   :  { %v1195_v8 = vsel %vm95_vm4, %v1158_v32, 0.0  ;;  %v1317_v30 = vsel %vm95_vm4, %v1280_v45, 0.0  ;;  %v942_v28 = vsel %vm2528_vm0, %v1533_v46, %v938_v56  ;;  %v965_v2 = vmul.f32 %v1535_v31, %v2913_v16 }
 0x16e   :  { %v947_v25 = vsel %vm944_vm1, %v946_v3, %v942_v28  ;;  %v426_v4 = vsub.f32 %v410_v20, %v2541_v9  ;;  %vm969_vm5 = vweird.f32 %v2913_v16  ;;  %v973_v48 = vand.u32 2147483647, %v2913_v16 }
 0x16f   :  { %v948_v12 = vmul.f32 %v947_v25, %v776_v53  ;;  %v966_v33 = vsub.f32 1.0, %v965_v2  ;;  %vm970_vm6 = vweird.f32 %v1535_v31  ;;  %v975_v51 = vand.u32 2147483648, %v2913_v16  ;;  %v2580_v2 = vld [vmem:[#allocation5 + $0x70] sm:$0xff] }
 0x170   :  { %v2548_v1 = vsel %vm95_vm4, %v1161_v55, 0.0  ;;  %v1196_v46 = vadd.f32 %v1195_v8, %v1194_v40  ;;  %v1318_v38 = vadd.f32 %v1317_v30, %v1316_v22  ;;  %v472_v23 = vadd.f32 1.0, %v456_v42  ;;  %vm2560_vm7 = vmor %vm969_vm5, %vm970_vm6 }
 0x171   :  { %v2550_v61 = vpop.eup %1536  ;;  %v2553_v27 = vsel %vm95_vm4, %v1283_v17, 0.0  ;;  %v1144_v11 = vmul.f32 %v2512_v58, %v948_v12  ;;  %v967_v32 = vmul.f32 %v1535_v31, %v966_v33  ;;  %v411_v45 = vmul.f32 0.0010405828, %v370_v52 }
 0x172   :  { %v442_v29 = vand.u32 2147483647, %v426_v4  ;;  %v778_v18 = vsel %vm762_vm3, 1.0, %v2016_v10  ;;  %v980_v22 = vmul.f32 %v2550_v61, %v2916_v36  ;;  %v413_v55 = vmul.f32 0.0010405828, %v393_v5 }
 0x173   :  { %v1266_v17 = vadd.f32 %v2512_v58, %v948_v12  ;;  %v968_v3 = vadd.f32 %v1535_v31, %v967_v32  ;;  %vm2567_vm8 = vcmp.eq.f32.partialorder %v973_v48, 8.507059e+37  ;;  %v976_v56 = vor.u32 1.1754944e-38, %v975_v51 }
 0x174   :  { %v1197_v42 = vrot.slane %v1196_v46, 4  ;;  %v1319_v10 = vrot.slane %v1318_v38, 4  ;;  %v1160_v47 = vmul.f32 %v1144_v11, %v472_v23  ;;  %v981_v16 = vsub.f32 1.0, %v980_v22 }
 0x175   :  { %v972_v53 = vsel %vm2560_vm7, %v1535_v31, %v968_v3  ;;  %v427_v8 = vsub.f32 %v411_v45, %v2573_v60  ;;  %vm984_vm9 = vweird.f32 %v2916_v36  ;;  %vm985_vm10 = vweird.f32 %v2550_v61  ;;  %v1560_v45 = vld [vmem:[#allocation2 + $0x60] sm:$0xff] }
 0x176   :  { %v458_v58 = vmul.f32 5.0, %v442_v29  ;;  %v988_v30 = vand.u32 2147483647, %v2916_v36  ;;  %v990_v28 = vand.u32 2147483648, %v2916_v36  ;;  %v429_v25 = vsub.f32 %v413_v55, %v2580_v2  ;;  %vm2590_vm11 = vmor %vm984_vm9, %vm985_vm10 }
 0x177   :  { %v1282_v4 = vmul.f32 %v1266_v17, %v472_v23  ;;  %v977_v31 = vsel %vm2567_vm8, %v976_v56, %v972_v53  ;;  %v982_v48 = vmul.f32 %v2550_v61, %v981_v16  ;;  %1538 = vrcp.f32 %v2100_v21  ;;  %v2927_v16 = vld [vmem:[#allocation28_spill] sm:$0xff] }
 0x178   :  { %v1198_v52 = vadd.f32 %v1197_v42, %v1196_v46  ;;  %v1320_v12 = vadd.f32 %v1319_v10, %v1318_v38  ;;  %v1204_v33 = vsel %vm95_vm4, %v1160_v47, 0.0  ;;  %v978_v51 = vmul.f32 %v977_v31, %v778_v18  ;;  %v373_v38 = vpop.f32.mrf.mxu1  ;;  %v2926_v10 = vld [vmem:[#allocation21_spill] sm:$0xff] }
 0x179   :  { %v2597_v23 = vadd.f32 %v1190_v39, %v2516_v59  ;;  %v443_v32 = vand.u32 2147483647, %v427_v8  ;;  %vm763_vm12 = vcmp.ge.f32.partialorder %v1560_v45, 0.0  ;;  %v983_v46 = vadd.f32 %v2550_v61, %v982_v48  ;;  %v2628_v31 = vld [vmem:[#allocation5 + $0x68] sm:$0xff] }
 0x17a   :  { %v474_v5 = vadd.f32 1.0, %v458_v58  ;;  %vm2600_vm13 = vcmp.eq.f32.partialorder %v988_v30, 8.507059e+37  ;;  %v991_v36 = vor.u32 1.1754944e-38, %v990_v28  ;;  %v445_v18 = vand.u32 2147483647, %v429_v25 }
 0x17b   :  { %v1205_v40 = vadd.f32 %v1204_v33, %v2501_v34  ;;  %v1326_v22 = vsel %vm95_vm4, %v1282_v4, 0.0  ;;  %v1146_v59 = vmul.f32 %v2541_v9, %v978_v51  ;;  %v987_v39 = vsel %vm2590_vm11, %v2550_v61, %v983_v46 }
 0x17c   :  { %v1199_v55 = vrot.slane %v1198_v52, 2  ;;  %v1321_v17 = vrot.slane %v1320_v12, 2  ;;  %v1268_v3 = vadd.f32 %v2541_v9, %v978_v51  ;;  %v412_v20 = vmul.f32 0.0010405828, %v373_v38  ;;  %v1561_v9 = vld [vmem:[#allocation2 + $0x70] sm:$0xff] }
 0x17d   :  { %v1539_v56 = vpop.eup %1538  ;;  %v2614_v42 = vadd.f32 %v1312_v43, %v2522_v50  ;;  %v459_v34 = vmul.f32 5.0, %v443_v32  ;;  %v779_v47 = vsel %vm763_vm12, 1.0, %v2926_v10  ;;  %1540 = vrcp.f32 %v2927_v16 }
 0x17e   :  { %v1327_v53 = vadd.f32 %v1326_v22, %v2504_v6  ;;  %v992_v61 = vsel %vm2600_vm13, %v991_v36, %v987_v39  ;;  %v461_v8 = vmul.f32 5.0, %v445_v18  ;;  %vm765_vm14 = vcmp.ge.f32.partialorder %v1561_v9, 0.0  ;;  %v1563_v39 = vld [vmem:[#allocation2 + $0x68] sm:$0xff] }
 0x17f   :  { %v1206_v58 = vrot.slane %v1205_v40, 4  ;;  %v1162_v30 = vmul.f32 %v1146_v59, %v474_v5  ;;  %v1010_v28 = vmul.f32 %v1539_v56, %v2100_v21  ;;  %v1018_v50 = vand.u32 2147483647, %v2100_v21 }
 0x180   :  { %v2624_v43 = vadd.f32 %v1199_v55, %v1198_v52  ;;  %v2626_v25 = vadd.f32 %v1321_v17, %v1320_v12  ;;  %v1284_v4 = vmul.f32 %v1268_v3, %v474_v5  ;;  %v428_v6 = vsub.f32 %v412_v20, %v2628_v31  ;;  %v396_v55 = vpop.f32.mrf.mxu2 }
 0x181   :  { %v475_v48 = vadd.f32 1.0, %v459_v34  ;;  %v993_v33 = vmul.f32 %v992_v61, %v779_v47  ;;  %v781_v51 = vsel %vm765_vm14, 1.0, %v2067_v49  ;;  %v1020_v11 = vand.u32 2147483648, %v2100_v21 }
 0x182   :  { %v1328_v32 = vrot.slane %v1327_v53, 4  ;;  %v1011_v45 = vsub.f32 1.0, %v1010_v28  ;;  %vm1014_vm15 = vweird.f32 %v2100_v21  ;;  %vm1015_vm0 = vweird.f32 %v1539_v56 }
 0x183   :  { %v1541_v52 = vpop.eup %1540  ;;  %v2634_v46 = vadd.f32 %v1206_v58, %v1205_v40  ;;  %v1213_v12 = vsel %vm95_vm4, %v1162_v30, 0.0  ;;  %v2637_v38 = vadd.f32 1.0, %v461_v8  ;;  %vm2639_vm1 = vcmp.eq.f32.partialorder %v1018_v50, 8.507059e+37  ;;  %vm2647_vm3 = vmor %vm1014_vm15, %vm1015_vm0  ;;  %v1565_v40 = vld [vmem:[#allocation2 + $0x78] sm:$0xff] }
 0x184   :  { %v1335_v49 = vsel %vm95_vm4, %v1284_v4, 0.0  ;;  %v1012_v29 = vmul.f32 %v1539_v56, %v1011_v45  ;;  %v444_v36 = vand.u32 2147483647, %v428_v6  ;;  %v995_v18 = vmul.f32 %v1541_v52, %v2927_v16  ;;  %v2672_v4 = vld [vmem:[#allocation5 + $0x78] sm:$0xff] }
 0x185   :  { %v1147_v21 = vmul.f32 %v2573_v60, %v993_v33  ;;  %v1269_v22 = vadd.f32 %v2573_v60, %v993_v33  ;;  %v1021_v59 = vor.u32 1.1754944e-38, %v1020_v11  ;;  %vm764_vm5 = vcmp.ge.f32.partialorder %v1563_v39, 0.0  ;;  %v2936_v11 = vld [vmem:[#allocation25_spill] sm:$0xff] }
 0x186   :  { %v1013_v17 = vadd.f32 %v1539_v56, %v1012_v29  ;;  %v996_v3 = vsub.f32 1.0, %v995_v18  ;;  %vm999_vm6 = vweird.f32 %v2927_v16  ;;  %vm1000_vm7 = vweird.f32 %v1541_v52 }
 0x187   :  { %v2653_v20 = vadd.f32 %v1213_v12, %v2548_v1  ;;  %v2656_v34 = vadd.f32 %v1335_v49, %v2553_v27  ;;  %v1003_v60 = vand.u32 2147483647, %v2927_v16  ;;  %v1005_v10 = vand.u32 2147483648, %v2927_v16  ;;  %vm2664_vm8 = vmor %vm999_vm6, %vm1000_vm7 }
 0x188   :  { %v1017_v47 = vsel %vm2647_vm3, %v1539_v56, %v1013_v17  ;;  %v460_v61 = vmul.f32 5.0, %v444_v36  ;;  %v997_v8 = vmul.f32 %v1541_v52, %v996_v3  ;;  %v414_v9 = vmul.f32 0.0010405828, %v396_v55 }
 0x189   :  { %v1163_v58 = vmul.f32 %v1147_v21, %v475_v48  ;;  %v1285_v30 = vmul.f32 %v1269_v22, %v475_v48  ;;  %v1022_v28 = vsel %vm2639_vm1, %v1021_v59, %v1017_v47  ;;  %vm2668_vm9 = vcmp.eq.f32.partialorder %v1003_v60, 8.507059e+37 }
 0x18a   :  { %vm1121_vm10 = vcmask 1042434   ;;  %v1023_v16 = vmul.f32 %v1022_v28, %v781_v51  ;;  %v998_v50 = vadd.f32 %v1541_v52, %v997_v8  ;;  %v1006_v56 = vor.u32 1.1754944e-38, %v1005_v10 }
 0x18b   :  { %v430_v6 = vsub.f32 %v414_v9, %v2672_v4  ;;  %vm1123_vm11 = vcmask 1043459   ;;  %v2675_v48 = vadd.f32 %v1328_v32, %v1327_v53  ;;  %v1215_v33 = vrot.slane %v2653_v20, 4 }
 0x18c   :  { %v780_v45 = vsel %vm764_vm5, 1.0, %v2936_v11  ;;  %1542 = vrcp.f32 %v2121_v62  ;;  %v1337_v12 = vrot.slane %v2656_v34, 4  ;;  %v476_v5 = vadd.f32 1.0, %v460_v61 }
 0x18d   :  { %v1002_v51 = vsel %vm2664_vm8, %v1541_v52, %v998_v50  ;;  %v446_v49 = vand.u32 2147483647, %v430_v6  ;;  %v1221_v29 = vsel %vm95_vm4, %v1163_v58, 0.0  ;;  %v1033_v32 = vand.u32 2147483647, %v2121_v62 }
 0x18e   :  { %v1007_v53 = vsel %vm2668_vm9, %v1006_v56, %v1002_v51  ;;  %v1035_v36 = vand.u32 2147483648, %v2121_v62  ;;  %v1343_v18 = vsel %vm95_vm4, %v1285_v30, 0.0  ;;  %v1149_v21 = vmul.f32 %v2580_v2, %v1023_v16 }
 0x18f   :  { %v1008_v22 = vmul.f32 %v1007_v53, %v780_v45  ;;  %vm766_vm12 = vcmp.ge.f32.partialorder %v1565_v40, 0.0  ;;  %v1271_v59 = vadd.f32 %v2580_v2, %v1023_v16  ;;  %v462_v52 = vmul.f32 5.0, %v446_v49 }
 0x190   :  { %vm1029_vm13 = vweird.f32 %v2121_v62  ;;  %v1082_v39 = vrot.slane %v2235_v19, 1  ;;  %vm2696_vm14 = vcmp.eq.f32.partialorder %v1033_v32, 8.507059e+37  ;;  %v1074_v60 = vadd.f32 %v1073_v63, %v2239_v26 }
 0x191   :  { %v1148_v55 = vmul.f32 %v2628_v31, %v1008_v22  ;;  %v1270_v17 = vadd.f32 %v2628_v31, %v1008_v22  ;;  %v1036_v47 = vor.u32 1.1754944e-38, %v1035_v36  ;;  %v1090_v61 = vadd.f32 %v1089_v14, %v2213_v15 }
 0x192   :  { %v1543_v10 = vpop.eup %1542  ;;  %v1083_v2 = vadd.f32 %v1082_v39, %v2235_v19  ;;  %v1098_v8 = vrot.slane %v2201_v7, 2  ;;  %v1106_v26 = vadd.f32 %v1105_v44, %v2241_v54  ;;  %v1122_v19 = vsel %vm1121_vm10, %v2196_v57, %v2348_v0 }
 0x193   :  { %v1164_v9 = vmul.f32 %v1148_v55, %v476_v5  ;;  %v1286_v31 = vmul.f32 %v1270_v17, %v476_v5  ;;  %v1025_v58 = vmul.f32 %v1543_v10, %v2121_v62  ;;  %vm1030_vm15 = vweird.f32 %v1543_v10 }
 0x194   :  { %v1091_v30 = vrot.slane %v1090_v61, 1  ;;  %v1099_v28 = vadd.f32 %v1098_v8, %v2201_v7  ;;  %v1124_v1 = vsel %vm1123_vm11, %v1074_v60, %v1122_v19  ;;  %v1107_v6 = vrot.slane %v1106_v26, 2  ;;  %vm2722_vm3 = vmor %vm1029_vm13, %vm1030_vm15 }
 0x195   :  { %v1222_v15 = vsel %vm95_vm4, %v1164_v9, 0.0  ;;  %v1344_v14 = vsel %vm95_vm4, %v1286_v31, 0.0  ;;  %v1026_v63 = vsub.f32 1.0, %v1025_v58  ;;  %vm1125_vm0 = vcmask 1044484  }
 0x196   :  { %v1223_v27 = vadd.f32 %v1222_v15, %v1221_v29  ;;  %v1345_v16 = vadd.f32 %v1344_v14, %v1343_v18  ;;  %v1092_v50 = vadd.f32 %v1091_v30, %v1090_v61  ;;  %v1100_v56 = vrot.slane %v1099_v28, 1 }
 0x197   :  { %v1027_v7 = vmul.f32 %v1543_v10, %v1026_v63  ;;  %vm1127_vm1 = vcmask 1045509   ;;  %v1126_v11 = vsel %vm1125_vm0, %v1083_v2, %v1124_v1  ;;  %v1108_v5 = vadd.f32 %v1107_v6, %v1106_v26 }
 0x198   :  { %v1224_v54 = vrot.slane %v1223_v27, 4  ;;  %v1346_v44 = vrot.slane %v1345_v16, 4  ;;  %v1101_v0 = vadd.f32 %v1100_v56, %v1099_v28  ;;  %v1128_v51 = vsel %vm1127_vm1, %v1092_v50, %v1126_v11 }
 0x199   :  { %v1028_v45 = vadd.f32 %v1543_v10, %v1027_v7  ;;  %vm1129_vm5 = vcmask 1046534   ;;  %v1216_v49 = vadd.f32 %v1215_v33, %v2653_v20  ;;  %v1338_v29 = vadd.f32 %v1337_v12, %v2656_v34 }
 0x19a   :  { %v1225_v53 = vadd.f32 %v1224_v54, %v1223_v27  ;;  %v782_v62 = vsel %vm766_vm12, 1.0, %v2093_v13  ;;  %v1208_v32 = vrot.slane %v2634_v46, 2  ;;  %v1347_v36 = vadd.f32 %v1346_v44, %v1345_v16 }
 0x19b   :  { %v1032_v18 = vsel %vm2722_vm3, %v1543_v10, %v1028_v45  ;;  %v1109_v22 = vrot.slane %v1108_v5, 1  ;;  %v1165_v39 = vmul.f32 %v1149_v21, %v2637_v38  ;;  %v1130_v20 = vsel %vm1129_vm5, %v1101_v0, %v1128_v51 }
 0x19c   :  { %v1037_v55 = vsel %vm2696_vm14, %v1036_v47, %v1032_v18  ;;  %vm1131_vm6 = vcmask 1047559   ;;  %v1287_v34 = vmul.f32 %v1271_v59, %v2637_v38  ;;  %v478_v33 = vadd.f32 1.0, %v462_v52 }
 0x19d   :  { %v1038_v12 = vmul.f32 %v1037_v55, %v782_v62  ;;  %v1110_v13 = vadd.f32 %v1109_v22, %v1108_v5  ;;  %v1330_v40 = vrot.slane %v2675_v48, 2  ;;  %v1217_v17 = vrot.slane %v1216_v49, 2 }
 0x19e   :  { %v1339_v60 = vrot.slane %v1338_v29, 2  ;;  %v1226_v2 = vrot.slane %v1225_v53, 2  ;;  %v1348_v10 = vrot.slane %v1347_v36, 2  ;;  %v1192_v47 = vrot.slane %v2597_v23, 1 }
 0x19f   :  { %v1150_v61 = vmul.f32 %v2672_v4, %v1038_v12  ;;  %v1272_v21 = vadd.f32 %v2672_v4, %v1038_v12  ;;  %v1132_v3 = vsel %vm1131_vm6, %v1110_v13, %v1130_v20  ;;  %v1314_v8 = vrot.slane %v2614_v42, 1 }
 0x1a0   :  { %v1201_v38 = vrot.slane %v2624_v43, 1  ;;  %v1323_v59 = vrot.slane %v2626_v25, 1  ;;  %1134 = vst.msk [vmem:[#allocation7] sm:$0xff] %vm95_vm4, %v1132_v3  ;;  %v1230_v52 = vsel %vm95_vm4, %v1165_v39, 0.0  ;;  %v1352_v9 = vsel %vm95_vm4, %v1287_v34, 0.0 }
 0x1a1   :  { %v1166_v31 = vmul.f32 %v1150_v61, %v478_v33  ;;  %v1288_v58 = vmul.f32 %v1272_v21, %v478_v33  ;;  %v1209_v4 = vadd.f32 %v1208_v32, %v2634_v46  ;;  %v1331_v30 = vadd.f32 %v1330_v40, %v2675_v48 }
 0x1a2   :  { %v1218_v28 = vadd.f32 %v1217_v17, %v1216_v49  ;;  %v1340_v26 = vadd.f32 %v1339_v60, %v1338_v29  ;;  %v1227_v19 = vadd.f32 %v1226_v2, %v1225_v53  ;;  %v1349_v15 = vadd.f32 %v1348_v10, %v1347_v36 }
 0x1a3   :  { %v1231_v14 = vsel %vm95_vm4, %v1166_v31, 0.0  ;;  %v1353_v63 = vsel %vm95_vm4, %v1288_v58, 0.0  ;;  %v1193_v1 = vadd.f32 %v1192_v47, %v2597_v23  ;;  %v1315_v27 = vadd.f32 %v1314_v8, %v2614_v42 }
 0x1a4   :  { %v1232_v16 = vadd.f32 %v1231_v14, %v1230_v52  ;;  %v1354_v50 = vadd.f32 %v1353_v63, %v1352_v9  ;;  %v1247_v46 = vsel %vm1119_vm2, %v2506_v35, %v2493_v24  ;;  %v1369_v48 = vsel %vm1119_vm2, %v2508_v41, %v2498_v37 }
 0x1a5   :  { %v1202_v56 = vadd.f32 %v1201_v38, %v2624_v43  ;;  %v1324_v7 = vadd.f32 %v1323_v59, %v2626_v25  ;;  %v1219_v6 = vrot.slane %v1218_v28, 1  ;;  %v1341_v54 = vrot.slane %v1340_v26, 1 }
 0x1a6   :  { %v1233_v44 = vrot.slane %v1232_v16, 4  ;;  %v1355_v23 = vrot.slane %v1354_v50, 4  ;;  %v1210_v57 = vrot.slane %v1209_v4, 1  ;;  %v1332_v42 = vrot.slane %v1331_v30, 1 }
 0x1a7   :  { %v1228_v0 = vrot.slane %v1227_v19, 1  ;;  %v1350_v11 = vrot.slane %v1349_v15, 1  ;;  %v1248_v45 = vsel %vm1121_vm10, %v1193_v1, %v1247_v46  ;;  %v1370_v24 = vsel %vm1121_vm10, %v1315_v27, %v1369_v48 }
 0x1a8   :  { %v1234_v35 = vadd.f32 %v1233_v44, %v1232_v16  ;;  %v1356_v5 = vadd.f32 %v1355_v23, %v1354_v50  ;;  %v1249_v37 = vsel %vm1123_vm11, %v1202_v56, %v1248_v45  ;;  %v1371_v41 = vsel %vm1123_vm11, %v1324_v7, %v1370_v24 }
 0x1a9   :  { %v1220_v43 = vadd.f32 %v1219_v6, %v1218_v28  ;;  %v1342_v25 = vadd.f32 %v1341_v54, %v1340_v26  ;;  %v1211_v29 = vadd.f32 %v1210_v57, %v1209_v4  ;;  %v1333_v53 = vadd.f32 %v1332_v42, %v1331_v30 }
 0x1aa   :  { %v1235_v51 = vrot.slane %v1234_v35, 2  ;;  %v1357_v49 = vrot.slane %v1356_v5, 2  ;;  %v1229_v62 = vadd.f32 %v1228_v0, %v1227_v19  ;;  %v1351_v32 = vadd.f32 %v1350_v11, %v1349_v15 }
 0x1ab   :  { %v1250_v22 = vsel %vm1125_vm0, %v1211_v29, %v1249_v37  ;;  %v1372_v39 = vsel %vm1125_vm0, %v1333_v53, %v1371_v41 }
 0x1ac   :  { %v1236_v36 = vadd.f32 %v1235_v51, %v1234_v35  ;;  %v1358_v18 = vadd.f32 %v1357_v49, %v1356_v5  ;;  %v1251_v34 = vsel %vm1127_vm1, %v1220_v43, %v1250_v22  ;;  %v1373_v33 = vsel %vm1127_vm1, %v1342_v25, %v1372_v39 }
 0x1ad   :  { %v1252_v12 = vsel %vm1129_vm5, %v1229_v62, %v1251_v34  ;;  %v1374_v13 = vsel %vm1129_vm5, %v1351_v32, %v1373_v33 }
 0x1ae   :  { %v1237_v55 = vrot.slane %v1236_v36, 1  ;;  %v1359_v20 = vrot.slane %v1358_v18, 1 }
 0x1b0   :  { %v1238_v40 = vadd.f32 %v1237_v55, %v1236_v36  ;;  %v1360_v17 = vadd.f32 %v1359_v20, %v1358_v18 }
 0x1b2   :  { %v1253_v60 = vsel %vm1131_vm6, %v1238_v40, %v1252_v12  ;;  %v1375_v2 = vsel %vm1131_vm6, %v1360_v17, %v1374_v13 }
 0x1b3   :  { %1256 = vst.msk [vmem:[#allocation7 + $0x8] sm:$0xff] %vm95_vm4, %v1253_v60 }
 0x1b4   :  { %1378 = vst.msk [vmem:[#allocation7 + $0x10] sm:$0xff] %vm95_vm4, %v1375_v2 }
 0x1b5   :  { %1391 = dma.vmem_to_hbm [thread:$0]  %s1384_s1, 384, %s1386_s23, [#allocation4], %s1645_s17, %s1645_s17, %s1646_s18  }
 0x1b6   :  { %1642 = dma.done.wait [#allocation4], 384  }
 0x1b7   :  { %1643 = vsyncadd [#allocation4], 4294966912 }
 0x1b8   :  { %1396 = vsyncpa [#allocation3], 1 }
 0x1b9   :  { %1397 = vsyncpa [#allocation6], 1 }
 0x1ba   :  { %1398 = vsyncpa [#allocation4], 1 }

</bundles_post_ra>
